<compile_context>
chip_gen: v5e
topology: v5e:2x2
jax: 0.10.0
libtpu: 0.0.40
codegen_flags: <defaults>
</compile_context>

<pallas_src>
import math

import jax
import jax.numpy as jnp
from jax import lax
from jax.experimental import pallas as pl
from jax.experimental.pallas import tpu as pltpu

# Small, module-consistent sizes (d_model divisible by h).
D_MODEL = 32
N_HEADS = 4
D_HEAD = D_MODEL // N_HEADS
D_FF = 64
N_LAYERS = 2
LN_EPS = 1e-5

# Crossover heuristic: below this token count the gridless single-TC form wins
# (fixed per-grid-step overhead ~0.35us); above it, split the batch across grid
# steps so v7x's 2nd TensorCore is used ("parallel" axis).
_BATCH_GRID_MIN_TOKENS = 1024


def _layer_norm(x, gamma, beta):
    mu = jnp.mean(x, axis=-1, keepdims=True)
    xc = x - mu
    var = jnp.mean(xc * xc, axis=-1, keepdims=True)
    return xc * lax.rsqrt(var + LN_EPS) * gamma + beta


def _gelu_exact(x):
    return 0.5 * x * (1.0 + lax.erf(x * (1.0 / math.sqrt(2.0))))


def _tree_sum(parts):
    """Pairwise (tree) sum so per-head results stay independent until the final adds."""
    parts = list(parts)
    while len(parts) > 1:
        nxt = [parts[i] + parts[i + 1] for i in range(0, len(parts) - 1, 2)]
        if len(parts) % 2:
            nxt.append(parts[-1])
        parts = nxt
    return parts[0]


def xcoder_kernel(x_ref, wattn_ref, battn_ref, w1_ref, b1_ref,
                  w2_ref, b2_ref, gamma_ref, beta_ref, o_ref):
    """Fused forward pass: all N_LAYERS (shared params) of the Xcoder encoder."""
    B, S, D = x_ref.shape
    H, dk = N_HEADS, D_HEAD
    BS = B * S
    scale = 1.0 / math.sqrt(dk)

    W = wattn_ref[...]                 # (D, D)  shared q / k / v / out projection
    w1 = w1_ref[...]                   # (D, D_FF)
    w2 = w2_ref[...]                   # (D_FF, D)

    # Hoist the (1, D) -> (BS, D) broadcasts out of the layer loop
    # (JAX does not CSE broadcast_in_dim).  Fine at this BS; revisit when tiled.
    b_attn = jnp.broadcast_to(battn_ref[...], (BS, D))
    b1 = jnp.broadcast_to(b1_ref[...], (BS, D_FF))
    b2 = jnp.broadcast_to(b2_ref[...], (BS, D))
    gamma = jnp.broadcast_to(gamma_ref[...], (BS, D))   # shared by both LayerNorms
    beta = jnp.broadcast_to(beta_ref[...], (BS, D))

    # Per-head lane masks, built once (pure VPU compares; no lane slicing / XLU).
    lane = lax.broadcasted_iota(jnp.int32, (1, 1, D), 2)
    head_masks = [((lane >= h * dk) & (lane < (h + 1) * dk)).astype(jnp.float32)
                  for h in range(H)]

    x = x_ref[...].reshape(BS, D).astype(jnp.float32)

    # nn.ModuleList([layer] * N): every layer uses the SAME parameters, so the
    # whole stack is fused here with activations resident in VMEM.
    # (Short fixed trip count -> static unroll; switch to fori_loop at larger N.)
    for _ in range(N_LAYERS):
        # --- multi-headed self attention (q = k = v: the 4 Linears share weights)
        proj = jnp.dot(x, W, preferred_element_type=jnp.float32) + b_attn   # (BS, D)
        p3 = proj.reshape(B, S, D)

        # Head-mask formulation:
        #   scores_h = (P * m_h) @ P^T  (only head-h lanes contribute)
        #   ctx_h    = softmax(scores_h) @ (P * m_h)
        # ctx_h is nonzero only in head-h lanes, so summing over heads yields the
        # concatenated multi-head context directly in (S, D) lane positions.
        ctx_parts = []
        for h in range(H):
            pm = p3 * head_masks[h]                                          # (B, S, D)
            s = jnp.einsum('bqd,bkd->bqk', pm, p3,
                           preferred_element_type=jnp.float32) * scale       # (B, S, S)
            s = s - jnp.max(s, axis=-1, keepdims=True)
            e = jnp.exp(s)
            a = e / jnp.sum(e, axis=-1, keepdims=True)                       # exact softmax
            # TODO(synk): attention / feed-forward dropout omitted (eval-mode
            #             identity); only the mask_in=None path is implemented.
            ctx_parts.append(jnp.einsum('bqk,bkd->bqd', a, pm,
                                        preferred_element_type=jnp.float32))
        ctx = _tree_sum(ctx_parts)                                           # (B, S, D)

        # Single output projection with the shared Linear (heads already merged).
        attn = jnp.dot(ctx.reshape(BS, D), W,
                       preferred_element_type=jnp.float32) + b_attn

        x = _layer_norm(x + attn, gamma, beta)

        # --- feed forward: ffnn2(gelu(ffnn1(x)))
        h1 = _gelu_exact(jnp.dot(x, w1, preferred_element_type=jnp.float32) + b1)
        ff = jnp.dot(h1, w2, preferred_element_type=jnp.float32) + b2

        x = _layer_norm(x + ff, gamma, beta)

    o_ref[...] = x.reshape(B, S, D).astype(o_ref.dtype)


def xcoder_forward(x, params, *, batch_grid=None):
    """Xcoder forward.

    batch_grid=False : one gridless pallas_call, whole batch + all layers fused
                       (best at tiny sizes; params DMA'd once, no grid overhead).
    batch_grid=True  : grid=(B,) with a "parallel" batch axis so v7x can spread
                       batch elements over its 2 TensorCores; params stay
                       resident via constant index_maps.
    Default: size-gated on B*S.
    """
    B, S, D = x.shape
    if batch_grid is None:
        batch_grid = (B * S) >= _BATCH_GRID_MIN_TOKENS

    if not batch_grid:
        vmem = lambda: pl.BlockSpec(memory_space=pltpu.MemorySpace.VMEM)
        return pl.pallas_call(
            xcoder_kernel,
            out_shape=jax.ShapeDtypeStruct(x.shape, x.dtype),
            in_specs=[vmem() for _ in range(1 + len(params))],
            out_specs=vmem(),
        )(x, *params)

    # One batch element per grid step; parameters use a constant index_map so
    # they are fetched once and stay VMEM-resident across steps.
    param_specs = [pl.BlockSpec(p.shape, lambda b, _nd=p.ndim: (0,) * _nd)
                   for p in params]
    return pl.pallas_call(
        xcoder_kernel,
        out_shape=jax.ShapeDtypeStruct(x.shape, x.dtype),
        grid=(B,),
        in_specs=[pl.BlockSpec((1, S, D), lambda b: (b, 0, 0))] + param_specs,
        out_specs=pl.BlockSpec((1, S, D), lambda b: (b, 0, 0)),
        compiler_params=pltpu.CompilerParams(dimension_semantics=("parallel",)),
    )(x, *params)


# ---------------- independent pure-JAX reference (mirrors the PyTorch module) ----
def _ref_layer_norm(x, gamma, beta, eps=LN_EPS):
    mu = jnp.mean(x, axis=-1, keepdims=True)
    var = jnp.mean((x - mu) ** 2, axis=-1, keepdims=True)
    return (x - mu) / jnp.sqrt(var + eps) * gamma + beta


def _ref_layer(x, params):
    wattn, battn, w1, b1, w2, b2, gamma, beta = params
    B, S, D = x.shape
    proj = x @ wattn + battn                                        # (B, S, D)
    q = proj.reshape(B, S, N_HEADS, D_HEAD).transpose(0, 2, 1, 3)   # (B, H, S, dk)
    scores = jnp.einsum('bhqd,bhkd->bhqk', q, q) / math.sqrt(D_HEAD)
    wgts = jax.nn.softmax(scores, axis=-1)
    attn = jnp.einsum('bhqk,bhkd->bhqd', wgts, q)
    attn = attn.transpose(0, 2, 1, 3).reshape(B, S, D)
    attn = attn @ wattn + battn
    x = _ref_layer_norm(x + attn, gamma, beta)
    ff = jax.nn.gelu(x @ w1 + b1, approximate=False) @ w2 + b2      # exact erf GELU
    return _ref_layer_norm(x + ff, gamma, beta)


def _ref_forward(x, params, n_layers=N_LAYERS):
    for _ in range(n_layers):
        x = _ref_layer(x, params)
    return x


if __name__ == "__main__":
    key = jax.random.PRNGKey(0)
    k = jax.random.split(key, 7)

    # Deterministic synthetic parameters (shapes implied by the module's __init__).
    wattn = 0.05 * jax.random.normal(k[0], (D_MODEL, D_MODEL), jnp.float32)
    battn = 0.05 * jax.random.normal(k[1], (1, D_MODEL), jnp.float32)
    w1 = 0.05 * jax.random.normal(k[2], (D_MODEL, D_FF), jnp.float32)
    b1 = 0.05 * jax.random.normal(k[3], (1, D_FF), jnp.float32)
    w2 = 0.05 * jax.random.normal(k[4], (D_FF, D_MODEL), jnp.float32)
    b2 = 0.05 * jax.random.normal(k[5], (1, D_MODEL), jnp.float32)
    gamma = jnp.ones((1, D_MODEL), jnp.float32)   # LayerNorm default init
    beta = jnp.zeros((1, D_MODEL), jnp.float32)
    params = (wattn, battn, w1, b1, w2, b2, gamma, beta)

    # Input: (batch=2, seq=8, d_model=32)
    x = jax.random.normal(k[6], (2, 8, D_MODEL), jnp.float32)

    # Kernel: toy size takes the gridless fused path; also exercise the
    # batch-parallel grid path (the v7x 2-TensorCore form) explicitly.
    out = jax.block_until_ready(xcoder_forward(x, params))
    out_grid = jax.block_until_ready(xcoder_forward(x, params, batch_grid=True))

    # Reference at float32 matmul precision (independent of the kernel helpers).
    with jax.default_matmul_precision("float32"):
        ref = jax.block_until_ready(_ref_forward(x, params))

    assert out.shape == x.shape
    # Exact softmax division restored -> tolerance tightened 5x vs the previous
    # approx-reciprocal version; remaining slack only covers MXU f32 multi-pass
    # rounding differences between the Mosaic kernel and the XLA reference.
    assert jnp.max(jnp.abs(out - ref)) < 1e-3, "Pallas kernel mismatch vs JAX reference"
    assert jnp.max(jnp.abs(out_grid - ref)) < 1e-3, "Grid-path kernel mismatch vs JAX reference"
    print("KERNEL_OK")
</pallas_src>

<mosaic_0001>
module attributes {stable_mosaic.version = 11 : i64} {
  func.func @xcoder_kernel(%arg0: memref<2x8x32xf32, #tpu.memory_space<vmem>>, %arg1: memref<32x32xf32, #tpu.memory_space<vmem>>, %arg2: memref<1x32xf32, #tpu.memory_space<vmem>>, %arg3: memref<32x64xf32, #tpu.memory_space<vmem>>, %arg4: memref<1x64xf32, #tpu.memory_space<vmem>>, %arg5: memref<64x32xf32, #tpu.memory_space<vmem>>, %arg6: memref<1x32xf32, #tpu.memory_space<vmem>>, %arg7: memref<1x32xf32, #tpu.memory_space<vmem>>, %arg8: memref<1x32xf32, #tpu.memory_space<vmem>>, %arg9: memref<2x8x32xf32, #tpu.memory_space<vmem>>) attributes {dimension_semantics = [], scalar_prefetch = 0 : i64, scratch_operands = 0 : i64, tpu.core_type = #tpu.core_type<tc>} {
    %c0 = arith.constant 0 : index
    %c0_0 = arith.constant 0 : index
    %0 = vector.load %arg1[%c0, %c0_0] : memref<32x32xf32, #tpu.memory_space<vmem>>, vector<32x32xf32>
    %c0_1 = arith.constant 0 : index
    %c0_2 = arith.constant 0 : index
    %1 = vector.load %arg3[%c0_1, %c0_2] : memref<32x64xf32, #tpu.memory_space<vmem>>, vector<32x64xf32>
    %c0_3 = arith.constant 0 : index
    %c0_4 = arith.constant 0 : index
    %2 = vector.load %arg5[%c0_3, %c0_4] : memref<64x32xf32, #tpu.memory_space<vmem>>, vector<64x32xf32>
    %c0_5 = arith.constant 0 : index
    %c0_6 = arith.constant 0 : index
    %3 = vector.load %arg2[%c0_5, %c0_6] : memref<1x32xf32, #tpu.memory_space<vmem>>, vector<1x32xf32>
    %4 = vector.shape_cast %3 : vector<1x32xf32> to vector<1x32xf32>
    %5 = vector.broadcast %4 : vector<1x32xf32> to vector<16x32xf32>
    %c0_7 = arith.constant 0 : index
    %c0_8 = arith.constant 0 : index
    %6 = vector.load %arg4[%c0_7, %c0_8] : memref<1x64xf32, #tpu.memory_space<vmem>>, vector<1x64xf32>
    %7 = vector.shape_cast %6 : vector<1x64xf32> to vector<1x64xf32>
    %8 = vector.broadcast %7 : vector<1x64xf32> to vector<16x64xf32>
    %c0_9 = arith.constant 0 : index
    %c0_10 = arith.constant 0 : index
    %9 = vector.load %arg6[%c0_9, %c0_10] : memref<1x32xf32, #tpu.memory_space<vmem>>, vector<1x32xf32>
    %10 = vector.shape_cast %9 : vector<1x32xf32> to vector<1x32xf32>
    %11 = vector.broadcast %10 : vector<1x32xf32> to vector<16x32xf32>
    %c0_11 = arith.constant 0 : index
    %c0_12 = arith.constant 0 : index
    %12 = vector.load %arg7[%c0_11, %c0_12] : memref<1x32xf32, #tpu.memory_space<vmem>>, vector<1x32xf32>
    %13 = vector.shape_cast %12 : vector<1x32xf32> to vector<1x32xf32>
    %14 = vector.broadcast %13 : vector<1x32xf32> to vector<16x32xf32>
    %c0_13 = arith.constant 0 : index
    %c0_14 = arith.constant 0 : index
    %15 = vector.load %arg8[%c0_13, %c0_14] : memref<1x32xf32, #tpu.memory_space<vmem>>, vector<1x32xf32>
    %16 = vector.shape_cast %15 : vector<1x32xf32> to vector<1x32xf32>
    %17 = vector.broadcast %16 : vector<1x32xf32> to vector<16x32xf32>
    %18 = tpu.iota {dimensions = array<i32: 2>} : vector<1x1x32xi32>
    %c0_i32 = arith.constant 0 : i32
    %19 = vector.broadcast %c0_i32 : i32 to vector<1x1x32xi32>
    %20 = arith.cmpi sge, %18, %19 : vector<1x1x32xi32>
    %c8_i32 = arith.constant 8 : i32
    %21 = vector.broadcast %c8_i32 : i32 to vector<1x1x32xi32>
    %22 = arith.cmpi slt, %18, %21 : vector<1x1x32xi32>
    %23 = arith.andi %20, %22 : vector<1x1x32xi1>
    %24 = arith.extui %23 : vector<1x1x32xi1> to vector<1x1x32xi32>
    %25 = arith.sitofp %24 : vector<1x1x32xi32> to vector<1x1x32xf32>
    %c8_i32_15 = arith.constant 8 : i32
    %26 = vector.broadcast %c8_i32_15 : i32 to vector<1x1x32xi32>
    %27 = arith.cmpi sge, %18, %26 : vector<1x1x32xi32>
    %c16_i32 = arith.constant 16 : i32
    %28 = vector.broadcast %c16_i32 : i32 to vector<1x1x32xi32>
    %29 = arith.cmpi slt, %18, %28 : vector<1x1x32xi32>
    %30 = arith.andi %27, %29 : vector<1x1x32xi1>
    %31 = arith.extui %30 : vector<1x1x32xi1> to vector<1x1x32xi32>
    %32 = arith.sitofp %31 : vector<1x1x32xi32> to vector<1x1x32xf32>
    %c16_i32_16 = arith.constant 16 : i32
    %33 = vector.broadcast %c16_i32_16 : i32 to vector<1x1x32xi32>
    %34 = arith.cmpi sge, %18, %33 : vector<1x1x32xi32>
    %c24_i32 = arith.constant 24 : i32
    %35 = vector.broadcast %c24_i32 : i32 to vector<1x1x32xi32>
    %36 = arith.cmpi slt, %18, %35 : vector<1x1x32xi32>
    %37 = arith.andi %34, %36 : vector<1x1x32xi1>
    %38 = arith.extui %37 : vector<1x1x32xi1> to vector<1x1x32xi32>
    %39 = arith.sitofp %38 : vector<1x1x32xi32> to vector<1x1x32xf32>
    %c24_i32_17 = arith.constant 24 : i32
    %40 = vector.broadcast %c24_i32_17 : i32 to vector<1x1x32xi32>
    %41 = arith.cmpi sge, %18, %40 : vector<1x1x32xi32>
    %c32_i32 = arith.constant 32 : i32
    %42 = vector.broadcast %c32_i32 : i32 to vector<1x1x32xi32>
    %43 = arith.cmpi slt, %18, %42 : vector<1x1x32xi32>
    %44 = arith.andi %41, %43 : vector<1x1x32xi1>
    %45 = arith.extui %44 : vector<1x1x32xi1> to vector<1x1x32xi32>
    %46 = arith.sitofp %45 : vector<1x1x32xi32> to vector<1x1x32xf32>
    %c0_18 = arith.constant 0 : index
    %c0_19 = arith.constant 0 : index
    %c0_20 = arith.constant 0 : index
    %47 = vector.load %arg0[%c0_18, %c0_19, %c0_20] : memref<2x8x32xf32, #tpu.memory_space<vmem>>, vector<2x8x32xf32>
    %48 = vector.shape_cast %47 : vector<2x8x32xf32> to vector<16x32xf32>
    %cst = arith.constant dense<0.000000e+00> : vector<16x32xf32>
    %49 = tpu.matmul %48, %0, %cst {dimension_numbers = #tpu.dot_dimension_numbers<[1], [0], [0], [1], [0, 0, 1, 1], [], []>} : vector<16x32xf32>, vector<32x32xf32>, vector<16x32xf32> -> vector<16x32xf32>
    %50 = arith.addf %49, %5 : vector<16x32xf32>
    %51 = vector.shape_cast %50 : vector<16x32xf32> to vector<2x8x32xf32>
    %52 = vector.broadcast %25 : vector<1x1x32xf32> to vector<2x8x32xf32>
    %53 = arith.mulf %51, %52 : vector<2x8x32xf32>
    "tpu.trace_start"() <{level = 10 : i32, message = "bqd,bkd->bqk"}> : () -> ()
    %cst_21 = arith.constant dense<0.000000e+00> : vector<2x8x8xf32>
    %54 = tpu.matmul %53, %51, %cst_21 {dimension_numbers = #tpu.dot_dimension_numbers<[2], [2], [1], [1], [0, 0, 0, 1, 1, 1], [0], [0]>} : vector<2x8x32xf32>, vector<2x8x32xf32>, vector<2x8x8xf32> -> vector<2x8x8xf32>
    "tpu.trace_stop"() : () -> ()
    %cst_22 = arith.constant 0.353553385 : f32
    %55 = vector.broadcast %cst_22 : f32 to vector<2x8x8xf32>
    %56 = arith.mulf %54, %55 : vector<2x8x8xf32>
    %cst_23 = arith.constant dense<0xFF800000> : vector<2x8xf32>
    %57 = vector.multi_reduction <maximumf>, %56, %cst_23 [2] : vector<2x8x8xf32> to vector<2x8xf32>
    %58 = vector.shape_cast %57 : vector<2x8xf32> to vector<2x8x1xf32>
    %59 = vector.broadcast %58 : vector<2x8x1xf32> to vector<2x8x8xf32>
    %60 = arith.subf %56, %59 : vector<2x8x8xf32>
    %61 = math.exp %60 : vector<2x8x8xf32>
    %cst_24 = arith.constant dense<0.000000e+00> : vector<2x8xf32>
    %62 = vector.multi_reduction <add>, %61, %cst_24 [2] : vector<2x8x8xf32> to vector<2x8xf32>
    %63 = vector.shape_cast %62 : vector<2x8xf32> to vector<2x8x1xf32>
    %64 = vector.broadcast %63 : vector<2x8x1xf32> to vector<2x8x8xf32>
    %65 = arith.divf %61, %64 : vector<2x8x8xf32>
    "tpu.trace_start"() <{level = 10 : i32, message = "bqk,bkd->bqd"}> : () -> ()
    %cst_25 = arith.constant dense<0.000000e+00> : vector<2x8x32xf32>
    %66 = tpu.matmul %65, %53, %cst_25 {dimension_numbers = #tpu.dot_dimension_numbers<[2], [1], [1], [2], [0, 0, 0, 1, 1, 2], [0], [0]>} : vector<2x8x8xf32>, vector<2x8x32xf32>, vector<2x8x32xf32> -> vector<2x8x32xf32>
    "tpu.trace_stop"() : () -> ()
    %67 = vector.broadcast %32 : vector<1x1x32xf32> to vector<2x8x32xf32>
    %68 = arith.mulf %51, %67 : vector<2x8x32xf32>
    "tpu.trace_start"() <{level = 10 : i32, message = "bqd,bkd->bqk"}> : () -> ()
    %cst_26 = arith.constant dense<0.000000e+00> : vector<2x8x8xf32>
    %69 = tpu.matmul %68, %51, %cst_26 {dimension_numbers = #tpu.dot_dimension_numbers<[2], [2], [1], [1], [0, 0, 0, 1, 1, 1], [0], [0]>} : vector<2x8x32xf32>, vector<2x8x32xf32>, vector<2x8x8xf32> -> vector<2x8x8xf32>
    "tpu.trace_stop"() : () -> ()
    %cst_27 = arith.constant 0.353553385 : f32
    %70 = vector.broadcast %cst_27 : f32 to vector<2x8x8xf32>
    %71 = arith.mulf %69, %70 : vector<2x8x8xf32>
    %cst_28 = arith.constant dense<0xFF800000> : vector<2x8xf32>
    %72 = vector.multi_reduction <maximumf>, %71, %cst_28 [2] : vector<2x8x8xf32> to vector<2x8xf32>
    %73 = vector.shape_cast %72 : vector<2x8xf32> to vector<2x8x1xf32>
    %74 = vector.broadcast %73 : vector<2x8x1xf32> to vector<2x8x8xf32>
    %75 = arith.subf %71, %74 : vector<2x8x8xf32>
    %76 = math.exp %75 : vector<2x8x8xf32>
    %cst_29 = arith.constant dense<0.000000e+00> : vector<2x8xf32>
    %77 = vector.multi_reduction <add>, %76, %cst_29 [2] : vector<2x8x8xf32> to vector<2x8xf32>
    %78 = vector.shape_cast %77 : vector<2x8xf32> to vector<2x8x1xf32>
    %79 = vector.broadcast %78 : vector<2x8x1xf32> to vector<2x8x8xf32>
    %80 = arith.divf %76, %79 : vector<2x8x8xf32>
    "tpu.trace_start"() <{level = 10 : i32, message = "bqk,bkd->bqd"}> : () -> ()
    %cst_30 = arith.constant dense<0.000000e+00> : vector<2x8x32xf32>
    %81 = tpu.matmul %80, %68, %cst_30 {dimension_numbers = #tpu.dot_dimension_numbers<[2], [1], [1], [2], [0, 0, 0, 1, 1, 2], [0], [0]>} : vector<2x8x8xf32>, vector<2x8x32xf32>, vector<2x8x32xf32> -> vector<2x8x32xf32>
    "tpu.trace_stop"() : () -> ()
    %82 = vector.broadcast %39 : vector<1x1x32xf32> to vector<2x8x32xf32>
    %83 = arith.mulf %51, %82 : vector<2x8x32xf32>
    "tpu.trace_start"() <{level = 10 : i32, message = "bqd,bkd->bqk"}> : () -> ()
    %cst_31 = arith.constant dense<0.000000e+00> : vector<2x8x8xf32>
    %84 = tpu.matmul %83, %51, %cst_31 {dimension_numbers = #tpu.dot_dimension_numbers<[2], [2], [1], [1], [0, 0, 0, 1, 1, 1], [0], [0]>} : vector<2x8x32xf32>, vector<2x8x32xf32>, vector<2x8x8xf32> -> vector<2x8x8xf32>
    "tpu.trace_stop"() : () -> ()
    %cst_32 = arith.constant 0.353553385 : f32
    %85 = vector.broadcast %cst_32 : f32 to vector<2x8x8xf32>
    %86 = arith.mulf %84, %85 : vector<2x8x8xf32>
    %cst_33 = arith.constant dense<0xFF800000> : vector<2x8xf32>
    %87 = vector.multi_reduction <maximumf>, %86, %cst_33 [2] : vector<2x8x8xf32> to vector<2x8xf32>
    %88 = vector.shape_cast %87 : vector<2x8xf32> to vector<2x8x1xf32>
    %89 = vector.broadcast %88 : vector<2x8x1xf32> to vector<2x8x8xf32>
    %90 = arith.subf %86, %89 : vector<2x8x8xf32>
    %91 = math.exp %90 : vector<2x8x8xf32>
    %cst_34 = arith.constant dense<0.000000e+00> : vector<2x8xf32>
    %92 = vector.multi_reduction <add>, %91, %cst_34 [2] : vector<2x8x8xf32> to vector<2x8xf32>
    %93 = vector.shape_cast %92 : vector<2x8xf32> to vector<2x8x1xf32>
    %94 = vector.broadcast %93 : vector<2x8x1xf32> to vector<2x8x8xf32>
    %95 = arith.divf %91, %94 : vector<2x8x8xf32>
    "tpu.trace_start"() <{level = 10 : i32, message = "bqk,bkd->bqd"}> : () -> ()
    %cst_35 = arith.constant dense<0.000000e+00> : vector<2x8x32xf32>
    %96 = tpu.matmul %95, %83, %cst_35 {dimension_numbers = #tpu.dot_dimension_numbers<[2], [1], [1], [2], [0, 0, 0, 1, 1, 2], [0], [0]>} : vector<2x8x8xf32>, vector<2x8x32xf32>, vector<2x8x32xf32> -> vector<2x8x32xf32>
    "tpu.trace_stop"() : () -> ()
    %97 = vector.broadcast %46 : vector<1x1x32xf32> to vector<2x8x32xf32>
    %98 = arith.mulf %51, %97 : vector<2x8x32xf32>
    "tpu.trace_start"() <{level = 10 : i32, message = "bqd,bkd->bqk"}> : () -> ()
    %cst_36 = arith.constant dense<0.000000e+00> : vector<2x8x8xf32>
    %99 = tpu.matmul %98, %51, %cst_36 {dimension_numbers = #tpu.dot_dimension_numbers<[2], [2], [1], [1], [0, 0, 0, 1, 1, 1], [0], [0]>} : vector<2x8x32xf32>, vector<2x8x32xf32>, vector<2x8x8xf32> -> vector<2x8x8xf32>
    "tpu.trace_stop"() : () -> ()
    %cst_37 = arith.constant 0.353553385 : f32
    %100 = vector.broadcast %cst_37 : f32 to vector<2x8x8xf32>
    %101 = arith.mulf %99, %100 : vector<2x8x8xf32>
    %cst_38 = arith.constant dense<0xFF800000> : vector<2x8xf32>
    %102 = vector.multi_reduction <maximumf>, %101, %cst_38 [2] : vector<2x8x8xf32> to vector<2x8xf32>
    %103 = vector.shape_cast %102 : vector<2x8xf32> to vector<2x8x1xf32>
    %104 = vector.broadcast %103 : vector<2x8x1xf32> to vector<2x8x8xf32>
    %105 = arith.subf %101, %104 : vector<2x8x8xf32>
    %106 = math.exp %105 : vector<2x8x8xf32>
    %cst_39 = arith.constant dense<0.000000e+00> : vector<2x8xf32>
    %107 = vector.multi_reduction <add>, %106, %cst_39 [2] : vector<2x8x8xf32> to vector<2x8xf32>
    %108 = vector.shape_cast %107 : vector<2x8xf32> to vector<2x8x1xf32>
    %109 = vector.broadcast %108 : vector<2x8x1xf32> to vector<2x8x8xf32>
    %110 = arith.divf %106, %109 : vector<2x8x8xf32>
    "tpu.trace_start"() <{level = 10 : i32, message = "bqk,bkd->bqd"}> : () -> ()
    %cst_40 = arith.constant dense<0.000000e+00> : vector<2x8x32xf32>
    %111 = tpu.matmul %110, %98, %cst_40 {dimension_numbers = #tpu.dot_dimension_numbers<[2], [1], [1], [2], [0, 0, 0, 1, 1, 2], [0], [0]>} : vector<2x8x8xf32>, vector<2x8x32xf32>, vector<2x8x32xf32> -> vector<2x8x32xf32>
    "tpu.trace_stop"() : () -> ()
    %112 = arith.addf %66, %81 : vector<2x8x32xf32>
    %113 = arith.addf %96, %111 : vector<2x8x32xf32>
    %114 = arith.addf %112, %113 : vector<2x8x32xf32>
    %115 = vector.shape_cast %114 : vector<2x8x32xf32> to vector<16x32xf32>
    %cst_41 = arith.constant dense<0.000000e+00> : vector<16x32xf32>
    %116 = tpu.matmul %115, %0, %cst_41 {dimension_numbers = #tpu.dot_dimension_numbers<[1], [0], [0], [1], [0, 0, 1, 1], [], []>} : vector<16x32xf32>, vector<32x32xf32>, vector<16x32xf32> -> vector<16x32xf32>
    %117 = arith.addf %116, %5 : vector<16x32xf32>
    %118 = arith.addf %48, %117 : vector<16x32xf32>
    %cst_42 = arith.constant dense<0.000000e+00> : vector<16xf32>
    %119 = vector.multi_reduction <add>, %118, %cst_42 [1] : vector<16x32xf32> to vector<16xf32>
    %120 = vector.shape_cast %119 : vector<16xf32> to vector<16x1xf32>
    %cst_43 = arith.constant 3.200000e+01 : f32
    %121 = vector.broadcast %cst_43 : f32 to vector<16x1xf32>
    %122 = arith.divf %120, %121 : vector<16x1xf32>
    %123 = vector.broadcast %122 : vector<16x1xf32> to vector<16x32xf32>
    %124 = arith.subf %118, %123 : vector<16x32xf32>
    %125 = arith.mulf %124, %124 : vector<16x32xf32>
    %cst_44 = arith.constant dense<0.000000e+00> : vector<16xf32>
    %126 = vector.multi_reduction <add>, %125, %cst_44 [1] : vector<16x32xf32> to vector<16xf32>
    %127 = vector.shape_cast %126 : vector<16xf32> to vector<16x1xf32>
    %cst_45 = arith.constant 3.200000e+01 : f32
    %128 = vector.broadcast %cst_45 : f32 to vector<16x1xf32>
    %129 = arith.divf %127, %128 : vector<16x1xf32>
    %cst_46 = arith.constant 9.99999974E-6 : f32
    %130 = vector.broadcast %cst_46 : f32 to vector<16x1xf32>
    %131 = arith.addf %129, %130 : vector<16x1xf32>
    %132 = math.rsqrt %131 : vector<16x1xf32>
    %133 = vector.broadcast %132 : vector<16x1xf32> to vector<16x32xf32>
    %134 = arith.mulf %124, %133 : vector<16x32xf32>
    %135 = arith.mulf %134, %14 : vector<16x32xf32>
    %136 = arith.addf %135, %17 : vector<16x32xf32>
    %cst_47 = arith.constant dense<0.000000e+00> : vector<16x64xf32>
    %137 = tpu.matmul %136, %1, %cst_47 {dimension_numbers = #tpu.dot_dimension_numbers<[1], [0], [0], [1], [0, 0, 1, 1], [], []>} : vector<16x32xf32>, vector<32x64xf32>, vector<16x64xf32> -> vector<16x64xf32>
    %138 = arith.addf %137, %8 : vector<16x64xf32>
    %cst_48 = arith.constant 5.000000e-01 : f32
    %139 = vector.broadcast %cst_48 : f32 to vector<16x64xf32>
    %140 = arith.mulf %139, %138 : vector<16x64xf32>
    %cst_49 = arith.constant 0.707106769 : f32
    %141 = vector.broadcast %cst_49 : f32 to vector<16x64xf32>
    %142 = arith.mulf %138, %141 : vector<16x64xf32>
    %143 = math.erf %142 : vector<16x64xf32>
    %cst_50 = arith.constant 1.000000e+00 : f32
    %144 = vector.broadcast %cst_50 : f32 to vector<16x64xf32>
    %145 = arith.addf %144, %143 : vector<16x64xf32>
    %146 = arith.mulf %140, %145 : vector<16x64xf32>
    %cst_51 = arith.constant dense<0.000000e+00> : vector<16x32xf32>
    %147 = tpu.matmul %146, %2, %cst_51 {dimension_numbers = #tpu.dot_dimension_numbers<[1], [0], [0], [1], [0, 0, 1, 1], [], []>} : vector<16x64xf32>, vector<64x32xf32>, vector<16x32xf32> -> vector<16x32xf32>
    %148 = arith.addf %147, %11 : vector<16x32xf32>
    %149 = arith.addf %136, %148 : vector<16x32xf32>
    %cst_52 = arith.constant dense<0.000000e+00> : vector<16xf32>
    %150 = vector.multi_reduction <add>, %149, %cst_52 [1] : vector<16x32xf32> to vector<16xf32>
    %151 = vector.shape_cast %150 : vector<16xf32> to vector<16x1xf32>
    %cst_53 = arith.constant 3.200000e+01 : f32
    %152 = vector.broadcast %cst_53 : f32 to vector<16x1xf32>
    %153 = arith.divf %151, %152 : vector<16x1xf32>
    %154 = vector.broadcast %153 : vector<16x1xf32> to vector<16x32xf32>
    %155 = arith.subf %149, %154 : vector<16x32xf32>
    %156 = arith.mulf %155, %155 : vector<16x32xf32>
    %cst_54 = arith.constant dense<0.000000e+00> : vector<16xf32>
    %157 = vector.multi_reduction <add>, %156, %cst_54 [1] : vector<16x32xf32> to vector<16xf32>
    %158 = vector.shape_cast %157 : vector<16xf32> to vector<16x1xf32>
    %cst_55 = arith.constant 3.200000e+01 : f32
    %159 = vector.broadcast %cst_55 : f32 to vector<16x1xf32>
    %160 = arith.divf %158, %159 : vector<16x1xf32>
    %cst_56 = arith.constant 9.99999974E-6 : f32
    %161 = vector.broadcast %cst_56 : f32 to vector<16x1xf32>
    %162 = arith.addf %160, %161 : vector<16x1xf32>
    %163 = math.rsqrt %162 : vector<16x1xf32>
    %164 = vector.broadcast %163 : vector<16x1xf32> to vector<16x32xf32>
    %165 = arith.mulf %155, %164 : vector<16x32xf32>
    %166 = arith.mulf %165, %14 : vector<16x32xf32>
    %167 = arith.addf %166, %17 : vector<16x32xf32>
    %cst_57 = arith.constant dense<0.000000e+00> : vector<16x32xf32>
    %168 = tpu.matmul %167, %0, %cst_57 {dimension_numbers = #tpu.dot_dimension_numbers<[1], [0], [0], [1], [0, 0, 1, 1], [], []>} : vector<16x32xf32>, vector<32x32xf32>, vector<16x32xf32> -> vector<16x32xf32>
    %169 = arith.addf %168, %5 : vector<16x32xf32>
    %170 = vector.shape_cast %169 : vector<16x32xf32> to vector<2x8x32xf32>
    %171 = vector.broadcast %25 : vector<1x1x32xf32> to vector<2x8x32xf32>
    %172 = arith.mulf %170, %171 : vector<2x8x32xf32>
    "tpu.trace_start"() <{level = 10 : i32, message = "bqd,bkd->bqk"}> : () -> ()
    %cst_58 = arith.constant dense<0.000000e+00> : vector<2x8x8xf32>
    %173 = tpu.matmul %172, %170, %cst_58 {dimension_numbers = #tpu.dot_dimension_numbers<[2], [2], [1], [1], [0, 0, 0, 1, 1, 1], [0], [0]>} : vector<2x8x32xf32>, vector<2x8x32xf32>, vector<2x8x8xf32> -> vector<2x8x8xf32>
    "tpu.trace_stop"() : () -> ()
    %cst_59 = arith.constant 0.353553385 : f32
    %174 = vector.broadcast %cst_59 : f32 to vector<2x8x8xf32>
    %175 = arith.mulf %173, %174 : vector<2x8x8xf32>
    %cst_60 = arith.constant dense<0xFF800000> : vector<2x8xf32>
    %176 = vector.multi_reduction <maximumf>, %175, %cst_60 [2] : vector<2x8x8xf32> to vector<2x8xf32>
    %177 = vector.shape_cast %176 : vector<2x8xf32> to vector<2x8x1xf32>
    %178 = vector.broadcast %177 : vector<2x8x1xf32> to vector<2x8x8xf32>
    %179 = arith.subf %175, %178 : vector<2x8x8xf32>
    %180 = math.exp %179 : vector<2x8x8xf32>
    %cst_61 = arith.constant dense<0.000000e+00> : vector<2x8xf32>
    %181 = vector.multi_reduction <add>, %180, %cst_61 [2] : vector<2x8x8xf32> to vector<2x8xf32>
    %182 = vector.shape_cast %181 : vector<2x8xf32> to vector<2x8x1xf32>
    %183 = vector.broadcast %182 : vector<2x8x1xf32> to vector<2x8x8xf32>
    %184 = arith.divf %180, %183 : vector<2x8x8xf32>
    "tpu.trace_start"() <{level = 10 : i32, message = "bqk,bkd->bqd"}> : () -> ()
    %cst_62 = arith.constant dense<0.000000e+00> : vector<2x8x32xf32>
    %185 = tpu.matmul %184, %172, %cst_62 {dimension_numbers = #tpu.dot_dimension_numbers<[2], [1], [1], [2], [0, 0, 0, 1, 1, 2], [0], [0]>} : vector<2x8x8xf32>, vector<2x8x32xf32>, vector<2x8x32xf32> -> vector<2x8x32xf32>
    "tpu.trace_stop"() : () -> ()
    %186 = vector.broadcast %32 : vector<1x1x32xf32> to vector<2x8x32xf32>
    %187 = arith.mulf %170, %186 : vector<2x8x32xf32>
    "tpu.trace_start"() <{level = 10 : i32, message = "bqd,bkd->bqk"}> : () -> ()
    %cst_63 = arith.constant dense<0.000000e+00> : vector<2x8x8xf32>
    %188 = tpu.matmul %187, %170, %cst_63 {dimension_numbers = #tpu.dot_dimension_numbers<[2], [2], [1], [1], [0, 0, 0, 1, 1, 1], [0], [0]>} : vector<2x8x32xf32>, vector<2x8x32xf32>, vector<2x8x8xf32> -> vector<2x8x8xf32>
    "tpu.trace_stop"() : () -> ()
    %cst_64 = arith.constant 0.353553385 : f32
    %189 = vector.broadcast %cst_64 : f32 to vector<2x8x8xf32>
    %190 = arith.mulf %188, %189 : vector<2x8x8xf32>
    %cst_65 = arith.constant dense<0xFF800000> : vector<2x8xf32>
    %191 = vector.multi_reduction <maximumf>, %190, %cst_65 [2] : vector<2x8x8xf32> to vector<2x8xf32>
    %192 = vector.shape_cast %191 : vector<2x8xf32> to vector<2x8x1xf32>
    %193 = vector.broadcast %192 : vector<2x8x1xf32> to vector<2x8x8xf32>
    %194 = arith.subf %190, %193 : vector<2x8x8xf32>
    %195 = math.exp %194 : vector<2x8x8xf32>
    %cst_66 = arith.constant dense<0.000000e+00> : vector<2x8xf32>
    %196 = vector.multi_reduction <add>, %195, %cst_66 [2] : vector<2x8x8xf32> to vector<2x8xf32>
    %197 = vector.shape_cast %196 : vector<2x8xf32> to vector<2x8x1xf32>
    %198 = vector.broadcast %197 : vector<2x8x1xf32> to vector<2x8x8xf32>
    %199 = arith.divf %195, %198 : vector<2x8x8xf32>
    "tpu.trace_start"() <{level = 10 : i32, message = "bqk,bkd->bqd"}> : () -> ()
    %cst_67 = arith.constant dense<0.000000e+00> : vector<2x8x32xf32>
    %200 = tpu.matmul %199, %187, %cst_67 {dimension_numbers = #tpu.dot_dimension_numbers<[2], [1], [1], [2], [0, 0, 0, 1, 1, 2], [0], [0]>} : vector<2x8x8xf32>, vector<2x8x32xf32>, vector<2x8x32xf32> -> vector<2x8x32xf32>
    "tpu.trace_stop"() : () -> ()
    %201 = vector.broadcast %39 : vector<1x1x32xf32> to vector<2x8x32xf32>
    %202 = arith.mulf %170, %201 : vector<2x8x32xf32>
    "tpu.trace_start"() <{level = 10 : i32, message = "bqd,bkd->bqk"}> : () -> ()
    %cst_68 = arith.constant dense<0.000000e+00> : vector<2x8x8xf32>
    %203 = tpu.matmul %202, %170, %cst_68 {dimension_numbers = #tpu.dot_dimension_numbers<[2], [2], [1], [1], [0, 0, 0, 1, 1, 1], [0], [0]>} : vector<2x8x32xf32>, vector<2x8x32xf32>, vector<2x8x8xf32> -> vector<2x8x8xf32>
    "tpu.trace_stop"() : () -> ()
    %cst_69 = arith.constant 0.353553385 : f32
    %204 = vector.broadcast %cst_69 : f32 to vector<2x8x8xf32>
    %205 = arith.mulf %203, %204 : vector<2x8x8xf32>
    %cst_70 = arith.constant dense<0xFF800000> : vector<2x8xf32>
    %206 = vector.multi_reduction <maximumf>, %205, %cst_70 [2] : vector<2x8x8xf32> to vector<2x8xf32>
    %207 = vector.shape_cast %206 : vector<2x8xf32> to vector<2x8x1xf32>
    %208 = vector.broadcast %207 : vector<2x8x1xf32> to vector<2x8x8xf32>
    %209 = arith.subf %205, %208 : vector<2x8x8xf32>
    %210 = math.exp %209 : vector<2x8x8xf32>
    %cst_71 = arith.constant dense<0.000000e+00> : vector<2x8xf32>
    %211 = vector.multi_reduction <add>, %210, %cst_71 [2] : vector<2x8x8xf32> to vector<2x8xf32>
    %212 = vector.shape_cast %211 : vector<2x8xf32> to vector<2x8x1xf32>
    %213 = vector.broadcast %212 : vector<2x8x1xf32> to vector<2x8x8xf32>
    %214 = arith.divf %210, %213 : vector<2x8x8xf32>
    "tpu.trace_start"() <{level = 10 : i32, message = "bqk,bkd->bqd"}> : () -> ()
    %cst_72 = arith.constant dense<0.000000e+00> : vector<2x8x32xf32>
    %215 = tpu.matmul %214, %202, %cst_72 {dimension_numbers = #tpu.dot_dimension_numbers<[2], [1], [1], [2], [0, 0, 0, 1, 1, 2], [0], [0]>} : vector<2x8x8xf32>, vector<2x8x32xf32>, vector<2x8x32xf32> -> vector<2x8x32xf32>
    "tpu.trace_stop"() : () -> ()
    %216 = vector.broadcast %46 : vector<1x1x32xf32> to vector<2x8x32xf32>
    %217 = arith.mulf %170, %216 : vector<2x8x32xf32>
    "tpu.trace_start"() <{level = 10 : i32, message = "bqd,bkd->bqk"}> : () -> ()
    %cst_73 = arith.constant dense<0.000000e+00> : vector<2x8x8xf32>
    %218 = tpu.matmul %217, %170, %cst_73 {dimension_numbers = #tpu.dot_dimension_numbers<[2], [2], [1], [1], [0, 0, 0, 1, 1, 1], [0], [0]>} : vector<2x8x32xf32>, vector<2x8x32xf32>, vector<2x8x8xf32> -> vector<2x8x8xf32>
    "tpu.trace_stop"() : () -> ()
    %cst_74 = arith.constant 0.353553385 : f32
    %219 = vector.broadcast %cst_74 : f32 to vector<2x8x8xf32>
    %220 = arith.mulf %218, %219 : vector<2x8x8xf32>
    %cst_75 = arith.constant dense<0xFF800000> : vector<2x8xf32>
    %221 = vector.multi_reduction <maximumf>, %220, %cst_75 [2] : vector<2x8x8xf32> to vector<2x8xf32>
    %222 = vector.shape_cast %221 : vector<2x8xf32> to vector<2x8x1xf32>
    %223 = vector.broadcast %222 : vector<2x8x1xf32> to vector<2x8x8xf32>
    %224 = arith.subf %220, %223 : vector<2x8x8xf32>
    %225 = math.exp %224 : vector<2x8x8xf32>
    %cst_76 = arith.constant dense<0.000000e+00> : vector<2x8xf32>
    %226 = vector.multi_reduction <add>, %225, %cst_76 [2] : vector<2x8x8xf32> to vector<2x8xf32>
    %227 = vector.shape_cast %226 : vector<2x8xf32> to vector<2x8x1xf32>
    %228 = vector.broadcast %227 : vector<2x8x1xf32> to vector<2x8x8xf32>
    %229 = arith.divf %225, %228 : vector<2x8x8xf32>
    "tpu.trace_start"() <{level = 10 : i32, message = "bqk,bkd->bqd"}> : () -> ()
    %cst_77 = arith.constant dense<0.000000e+00> : vector<2x8x32xf32>
    %230 = tpu.matmul %229, %217, %cst_77 {dimension_numbers = #tpu.dot_dimension_numbers<[2], [1], [1], [2], [0, 0, 0, 1, 1, 2], [0], [0]>} : vector<2x8x8xf32>, vector<2x8x32xf32>, vector<2x8x32xf32> -> vector<2x8x32xf32>
    "tpu.trace_stop"() : () -> ()
    %231 = arith.addf %185, %200 : vector<2x8x32xf32>
    %232 = arith.addf %215, %230 : vector<2x8x32xf32>
    %233 = arith.addf %231, %232 : vector<2x8x32xf32>
    %234 = vector.shape_cast %233 : vector<2x8x32xf32> to vector<16x32xf32>
    %cst_78 = arith.constant dense<0.000000e+00> : vector<16x32xf32>
    %235 = tpu.matmul %234, %0, %cst_78 {dimension_numbers = #tpu.dot_dimension_numbers<[1], [0], [0], [1], [0, 0, 1, 1], [], []>} : vector<16x32xf32>, vector<32x32xf32>, vector<16x32xf32> -> vector<16x32xf32>
    %236 = arith.addf %235, %5 : vector<16x32xf32>
    %237 = arith.addf %167, %236 : vector<16x32xf32>
    %cst_79 = arith.constant dense<0.000000e+00> : vector<16xf32>
    %238 = vector.multi_reduction <add>, %237, %cst_79 [1] : vector<16x32xf32> to vector<16xf32>
    %239 = vector.shape_cast %238 : vector<16xf32> to vector<16x1xf32>
    %cst_80 = arith.constant 3.200000e+01 : f32
    %240 = vector.broadcast %cst_80 : f32 to vector<16x1xf32>
    %241 = arith.divf %239, %240 : vector<16x1xf32>
    %242 = vector.broadcast %241 : vector<16x1xf32> to vector<16x32xf32>
    %243 = arith.subf %237, %242 : vector<16x32xf32>
    %244 = arith.mulf %243, %243 : vector<16x32xf32>
    %cst_81 = arith.constant dense<0.000000e+00> : vector<16xf32>
    %245 = vector.multi_reduction <add>, %244, %cst_81 [1] : vector<16x32xf32> to vector<16xf32>
    %246 = vector.shape_cast %245 : vector<16xf32> to vector<16x1xf32>
    %cst_82 = arith.constant 3.200000e+01 : f32
    %247 = vector.broadcast %cst_82 : f32 to vector<16x1xf32>
    %248 = arith.divf %246, %247 : vector<16x1xf32>
    %cst_83 = arith.constant 9.99999974E-6 : f32
    %249 = vector.broadcast %cst_83 : f32 to vector<16x1xf32>
    %250 = arith.addf %248, %249 : vector<16x1xf32>
    %251 = math.rsqrt %250 : vector<16x1xf32>
    %252 = vector.broadcast %251 : vector<16x1xf32> to vector<16x32xf32>
    %253 = arith.mulf %243, %252 : vector<16x32xf32>
    %254 = arith.mulf %253, %14 : vector<16x32xf32>
    %255 = arith.addf %254, %17 : vector<16x32xf32>
    %cst_84 = arith.constant dense<0.000000e+00> : vector<16x64xf32>
    %256 = tpu.matmul %255, %1, %cst_84 {dimension_numbers = #tpu.dot_dimension_numbers<[1], [0], [0], [1], [0, 0, 1, 1], [], []>} : vector<16x32xf32>, vector<32x64xf32>, vector<16x64xf32> -> vector<16x64xf32>
    %257 = arith.addf %256, %8 : vector<16x64xf32>
    %cst_85 = arith.constant 5.000000e-01 : f32
    %258 = vector.broadcast %cst_85 : f32 to vector<16x64xf32>
    %259 = arith.mulf %258, %257 : vector<16x64xf32>
    %cst_86 = arith.constant 0.707106769 : f32
    %260 = vector.broadcast %cst_86 : f32 to vector<16x64xf32>
    %261 = arith.mulf %257, %260 : vector<16x64xf32>
    %262 = math.erf %261 : vector<16x64xf32>
    %cst_87 = arith.constant 1.000000e+00 : f32
    %263 = vector.broadcast %cst_87 : f32 to vector<16x64xf32>
    %264 = arith.addf %263, %262 : vector<16x64xf32>
    %265 = arith.mulf %259, %264 : vector<16x64xf32>
    %cst_88 = arith.constant dense<0.000000e+00> : vector<16x32xf32>
    %266 = tpu.matmul %265, %2, %cst_88 {dimension_numbers = #tpu.dot_dimension_numbers<[1], [0], [0], [1], [0, 0, 1, 1], [], []>} : vector<16x64xf32>, vector<64x32xf32>, vector<16x32xf32> -> vector<16x32xf32>
    %267 = arith.addf %266, %11 : vector<16x32xf32>
    %268 = arith.addf %255, %267 : vector<16x32xf32>
    %cst_89 = arith.constant dense<0.000000e+00> : vector<16xf32>
    %269 = vector.multi_reduction <add>, %268, %cst_89 [1] : vector<16x32xf32> to vector<16xf32>
    %270 = vector.shape_cast %269 : vector<16xf32> to vector<16x1xf32>
    %cst_90 = arith.constant 3.200000e+01 : f32
    %271 = vector.broadcast %cst_90 : f32 to vector<16x1xf32>
    %272 = arith.divf %270, %271 : vector<16x1xf32>
    %273 = vector.broadcast %272 : vector<16x1xf32> to vector<16x32xf32>
    %274 = arith.subf %268, %273 : vector<16x32xf32>
    %275 = arith.mulf %274, %274 : vector<16x32xf32>
    %cst_91 = arith.constant dense<0.000000e+00> : vector<16xf32>
    %276 = vector.multi_reduction <add>, %275, %cst_91 [1] : vector<16x32xf32> to vector<16xf32>
    %277 = vector.shape_cast %276 : vector<16xf32> to vector<16x1xf32>
    %cst_92 = arith.constant 3.200000e+01 : f32
    %278 = vector.broadcast %cst_92 : f32 to vector<16x1xf32>
    %279 = arith.divf %277, %278 : vector<16x1xf32>
    %cst_93 = arith.constant 9.99999974E-6 : f32
    %280 = vector.broadcast %cst_93 : f32 to vector<16x1xf32>
    %281 = arith.addf %279, %280 : vector<16x1xf32>
    %282 = math.rsqrt %281 : vector<16x1xf32>
    %283 = vector.broadcast %282 : vector<16x1xf32> to vector<16x32xf32>
    %284 = arith.mulf %274, %283 : vector<16x32xf32>
    %285 = arith.mulf %284, %14 : vector<16x32xf32>
    %286 = arith.addf %285, %17 : vector<16x32xf32>
    %287 = vector.shape_cast %286 : vector<16x32xf32> to vector<2x8x32xf32>
    %c0_94 = arith.constant 0 : index
    %c0_95 = arith.constant 0 : index
    %c0_96 = arith.constant 0 : index
    %288 = vector.load %arg9[%c0_94, %c0_95, %c0_96] : memref<2x8x32xf32, #tpu.memory_space<vmem>>, vector<2x8x32xf32>
    tpu.vector_store %arg9[%c0_94, %c0_95, %c0_96], %287 {strides = array<i32>} : memref<2x8x32xf32, #tpu.memory_space<vmem>>, vector<2x8x32xf32>,
    return
  }
}

</mosaic_0001>

<bundles_post_ra>
// kernel: tpu_custom_call.1
= control target key start
LH: loop header
LB: loop body
LE: loop exit
PB: predicated region body
PF: predicated region fallthrough
CT: control target
= control target key end

     0   :  { %s2741_s0 = inlined_call_operand.vmem [shape: f32[2,8,32], index: 0, kind: input, shape index: {}]   ;;  %s2742_s1 = inlined_call_operand.vmem [shape: f32[32,32], index: 1, kind: input, shape index: {}]   ;;  %s2743_s2 = inlined_call_operand.vmem [shape: f32[1,32], index: 2, kind: input, shape index: {}]   ;;  %s2744_s3 = inlined_call_operand.vmem [shape: f32[32,64], index: 3, kind: input, shape index: {}]   ;;  %s2745_s4 = inlined_call_operand.vmem [shape: f32[1,64], index: 4, kind: input, shape index: {}]   ;;  %s2746_s5 = inlined_call_operand.vmem [shape: f32[64,32], index: 5, kind: input, shape index: {}]   ;;  %s2747_s6 = inlined_call_operand.vmem [shape: f32[1,32], index: 6, kind: input, shape index: {}]   ;;  %s2748_s7 = inlined_call_operand.vmem [shape: f32[1,32], index: 7, kind: input, shape index: {}]   ;;  %s2749_s8 = inlined_call_operand.vmem [shape: f32[1,32], index: 8, kind: input, shape index: {}]   ;;  %s2750_s9 = inlined_call_operand.hbm [shape: f32[2,8,32], index: 9, kind: output, shape index: {}]  }
   0x1   :  { %v2164_v0 = vld [vmem:[%s2742_s1 + $0x18] sm:$0xff]  ;;  %v2169_v1 = vld [vmem:[%s2742_s1 + $0x10] sm:$0xff]  ;;  %v2175_v2 = vld [vmem:[%s2742_s1 + $0x8] sm:$0xff] }
   0x2   :  { %112 = vmatpush.msra.mxu0 %v2164_v0  ;;  %v2181_v3 = vld [vmem:[%s2742_s1] sm:$0xff] }
   0x4   :  { %113 = vmatpush.msra.mxu0 %v2169_v1 }
   0x5   :  { %14 = vsyncpa [#allocation3], 0  ;;  %v2187_v4 = vld [vmem:[%s2741_s0] sm:$0xff]  ;;  %vm93_vm0 = vcmask 261120   ;;  %v2195_v5 = vld [vmem:[%s2741_s0 + $0x8] sm:$0xff]  ;;  %v69_v6 = vlaneseq  ;;  %v2106_v10 = vmov 0.0  }
   0x6   :  { %114 = vmatpush.msra.mxu0 %v2175_v2  ;;  %v2202_v8 = vld [vmem:[%s2743_s2] ss:$0 sm:$0xff]  ;;  %vm179_vm11 = vcmask 64512   ;;  %s1887_s23 = sshll.u32 %s2750_s9, 4  ;;  %s2109_s24 = smov 128   ;;  %s1888_s23 = int_to_ptr.hbm [resolvable:$true] %s1887_s23 }
   0x7   :  { %v70_v7 = vand.u32 127, %v69_v6  ;;  %s2110_s25 = smov 8  }
   0x8   :  { %115 = vmatpush.msra.mxu0 %v2181_v3 }
   0x9   :  { %1903 = vmatmul.msk.f32.vlgmr.msra.gmra.mxu0 %vm93_vm0, %v2187_v4  ;;  %vm76_vm1 = vcmp.ge.s32.totalorder %v70_v7, 8  ;;  %vm77_vm2 = vcmp.lt.s32.totalorder %v70_v7, 16  ;;  %vm72_vm4 = vcmp.lt.s32.totalorder %v70_v7, 8  ;;  %vm86_vm5 = vcmp.ge.s32.totalorder %v70_v7, 24 }
   0xa   :  { %vm78_vm3 = vmand %vm76_vm1, %vm77_vm2  ;;  %v2206_v12 = vsel %vm72_vm4, 1.0, %v2106_v10  ;;  %vm87_vm6 = vcmp.lt.s32.totalorder %v70_v7, 32  ;;  %vm81_vm8 = vcmp.ge.s32.totalorder %v70_v7, 16  ;;  %vm82_vm9 = vcmp.lt.s32.totalorder %v70_v7, 24 }
   0xb   :  { %v2204_v11 = vsel %vm78_vm3, 1.0, %v2106_v10  ;;  %vm88_vm7 = vmand %vm86_vm5, %vm87_vm6 }
   0xc   :  { %v2219_v18 = vsel %vm88_vm7, 1.0, %v2106_v10  ;;  %vm83_vm10 = vmand %vm81_vm8, %vm82_vm9 }
   0xd   :  { %v2247_v23 = vsel %vm83_vm10, 1.0, %v2106_v10 }
  0x11   :  { %1904 = vmatmul.msk.f32.gmra.mxu0 %vm93_vm0, %v2195_v5 }
  0x86   :  { %v117_v9 = vpop.f32.mrf.mxu0 }
  0x87   :  { %v118_v13 = vadd.f32 %v2202_v8, %v117_v9 }
  0x89   :  { %1905 = vmatpush.xpose.msk.msra.mxu1 %vm93_vm0, %v118_v13  ;;  %v228_v14 = vmul.f32 %v2204_v11, %v118_v13  ;;  %v2212_v15 = vmul.f32 %v2206_v12, %v118_v13  ;;  %v2241_v22 = vmul.f32 %v2219_v18, %v118_v13  ;;  %v372_v24 = vmul.f32 %v2247_v23, %v118_v13 }
  0x8b   :  { %344 = vmatpush.msra.mxu2 %v228_v14 }
  0x8c   :  { %1906 = vmatmul.msk.f32.vlgmr.msra.gmra.mxu1 %vm93_vm0, %v2212_v15 }
  0x8e   :  { %v120_v16 = vpop.f32.mrf.mxu0 }
  0x8f   :  { %v2217_v17 = vadd.f32 %v2202_v8, %v120_v16 }
  0x91   :  { %1907 = vmatpush.xpose.msk.msra.mxu3 %vm93_vm0, %v2217_v17  ;;  %1911 = vmatpush.xpose.msk.msrb.mxu1 %vm93_vm0, %v2217_v17  ;;  %v124_v19 = vmul.f32 %v2206_v12, %v2217_v17  ;;  %v229_v20 = vmul.f32 %v2204_v11, %v2217_v17  ;;  %v2231_v21 = vmul.f32 %v2219_v18, %v2217_v17 }
  0x92   :  { %1917 = vmatpush.xpose.msk.msrb.mxu2 %vm93_vm0, %v2217_v17  ;;  %1921 = vmatpush.xpose.msk.msrb.mxu0 %vm93_vm0, %v2217_v17 }
  0x94   :  { %1908 = vmatmul.msk.f32.vlgmr.msra.gmra.mxu3 %vm93_vm0, %v124_v19  ;;  %1912 = vmatmul.msk.f32.vlgmr.msrb.gmra.mxu1 %vm93_vm0, %v229_v20 }
  0x95   :  { %1909 = vmatpush.xpose.msk.msrb.mxu3 %vm93_vm0, %v118_v13  ;;  %1915 = vmatpush.xpose.msk.msra.mxu1 %vm93_vm0, %v118_v13 }
  0x96   :  { %655 = vmatpush.msra.mxu0 %v124_v19 }
  0x97   :  { %1922 = vmatmul.msk.f32.vlgmr.msrb.gmra.mxu0 %vm93_vm0, %v2231_v21 }
  0x99   :  { %367 = vmatpush.msra.mxu3 %v229_v20  ;;  %586 = vmatpush.msrb.mxu1 %v2241_v22 }
  0x9c   :  { %1910 = vmatmul.msk.f32.vlgmr.msrb.gmra.mxu3 %vm93_vm0, %v228_v14  ;;  %1916 = vmatmul.msk.f32.vlgmr.msra.gmra.mxu1 %vm93_vm0, %v372_v24 }
  0x9d   :  { %1919 = vmatpush.xpose.msk.msrb.mxu3 %vm93_vm0, %v118_v13  ;;  %678 = vmatpush.msra.mxu1 %v372_v24 }
 0x109   :  { %v2253_v25 = vpop.f32.mrf.mxu1 }
 0x111   :  { %v273_v26 = vpop.f32.mrf.mxu1 }
 0x112   :  { %v277_v27 = vmul.f32 0.35355338, %v273_v26 }
 0x114   :  { %v281_v28 = vsel %vm179_vm11, %v277_v27, -inf  ;;  %v515_v33 = vpop.f32.mrf.mxu0 }
 0x115   :  { %282 = vmax.xlane.f32.xlu0 %v281_v28  ;;  %v519_v34 = vmul.f32 0.35355338, %v515_v33 }
 0x117   :  { %v174_v29 = vpop.f32.mrf.mxu3  ;;  %v523_v35 = vsel %vm179_vm11, %v519_v34, -inf }
 0x118   :  { %v178_v36 = vmul.f32 0.35355338, %v174_v29 }
 0x119   :  { %v394_v51 = vpop.f32.mrf.mxu1 }
 0x11a   :  { %v183_v37 = vsel %vm179_vm11, %v178_v36, -inf  ;;  %v2264_v52 = vmul.f32 0.35355338, %v394_v51 }
 0x11c   :  { %v422_v57 = vsel %vm179_vm11, %v2264_v52, -inf }
 0x11f   :  { %v250_v30 = vpop.f32.mrf.mxu3 }
 0x120   :  { %v276_v31 = vmul.f32 0.35355338, %v250_v30 }
 0x122   :  { %v278_v32 = vsel %vm179_vm11, %v276_v31, -inf }
 0x123   :  { %279 = vmax.xlane.f32.xlu0 %v278_v32 }
 0x12b   :  { %524 = vmax.xlane.f32.xlu0 %v523_v35 }
 0x133   :  { %184 = vmax.xlane.f32.xlu0 %v183_v37 }
 0x188   :  { %v283_v38 = vpop.xlane.xlu0 %282 }
 0x189   :  { %v285_v39 = vsub.f32 %v277_v27, %v283_v38 }
 0x18b   :  { %v288_v40 = vmul.f32 1.442695, %v285_v39 }
 0x18d   :  { %1981 = vpow2.f32 %v288_v40 }
 0x193   :  { %v1982_v41 = vpop.eup %1981 }
 0x194   :  { %v293_v42 = vsel %vm179_vm11, %v1982_v41, 0.0 }
 0x195   :  { %294 = vadd.xlane.f32.xlu1 %v293_v42 }
 0x196   :  { %v280_v43 = vpop.xlane.xlu0 %279 }
 0x197   :  { %v284_v44 = vsub.f32 %v276_v31, %v280_v43 }
 0x199   :  { %v286_v45 = vmul.f32 1.442695, %v284_v44 }
 0x19b   :  { %1983 = vpow2.f32 %v286_v45 }
 0x19e   :  { %v525_v46 = vpop.xlane.xlu0 %524 }
 0x19f   :  { %v527_v47 = vsub.f32 %v519_v34, %v525_v46 }
 0x1a1   :  { %v2260_v48 = vpop.eup %1983  ;;  %v530_v49 = vmul.f32 1.442695, %v527_v47 }
 0x1a2   :  { %v290_v50 = vsel %vm179_vm11, %v2260_v48, 0.0 }
 0x1a3   :  { %1985 = vpow2.f32 %v530_v49  ;;  %291 = vadd.xlane.f32.xlu1 %v290_v50 }
 0x1a6   :  { %v185_v53 = vpop.xlane.xlu0 %184 }
 0x1a7   :  { %v187_v54 = vsub.f32 %v178_v36, %v185_v53 }
 0x1a9   :  { %v2266_v55 = vpop.eup %1985  ;;  %v190_v56 = vmul.f32 1.442695, %v187_v54 }
 0x1aa   :  { %v535_v58 = vsel %vm179_vm11, %v2266_v55, 0.0 }
 0x1ab   :  { %1987 = vpow2.f32 %v190_v56  ;;  %423 = vmax.xlane.f32.xlu1 %v422_v57  ;;  %536 = vadd.xlane.f32.xlu0 %v535_v58 }
 0x1b1   :  { %v2272_v59 = vpop.eup %1987 }
 0x1b2   :  { %v195_v60 = vsel %vm179_vm11, %v2272_v59, 0.0 }
 0x1b3   :  { %196 = vadd.xlane.f32.xlu0 %v195_v60 }
 0x208   :  { %v295_v61 = vpop.xlane.xlu1 %294 }
 0x209   :  { %1989 = vrcp.f32 %v295_v61  ;;  %v322_v7 = vand.u32 2147483648, %v295_v61  ;;  %v320_v10 = vand.u32 2147483647, %v295_v61  ;;  %vm316_vm13 = vweird.f32 %v295_v61 }
 0x20b   :  { %v323_v16 = vor.u32 1.1754944e-38, %v322_v7  ;;  %vm321_vm15 = vcmp.eq.f32.partialorder %v320_v10, 8.507059e+37 }
 0x20f   :  { %v1990_v62 = vpop.eup %1989 }
 0x210   :  { %v312_v63 = vmul.f32 %v1990_v62, %v295_v61  ;;  %vm317_vm12 = vweird.f32 %v1990_v62 }
 0x211   :  { %vm318_vm14 = vmor %vm316_vm13, %vm317_vm12 }
 0x212   :  { %v313_v6 = vsub.f32 1.0, %v312_v63 }
 0x214   :  { %v314_v9 = vmul.f32 %v1990_v62, %v313_v6  ;;  %v177_v6 = vmul.f32 0.35355338, %v2253_v25 }
 0x216   :  { %v292_v13 = vpop.xlane.xlu1 %291  ;;  %v315_v14 = vadd.f32 %v1990_v62, %v314_v9  ;;  %v180_v7 = vsel %vm179_vm11, %v177_v6, -inf }
 0x217   :  { %1991 = vrcp.f32 %v292_v13  ;;  %v307_v31 = vand.u32 2147483648, %v292_v13  ;;  %v305_v32 = vand.u32 2147483647, %v292_v13  ;;  %vm301_vm2 = vweird.f32 %v292_v13 }
 0x218   :  { %v319_v19 = vsel %vm318_vm14, %v1990_v62, %v315_v14 }
 0x219   :  { %v324_v20 = vsel %vm321_vm15, %v323_v16, %v319_v19  ;;  %v308_v35 = vor.u32 1.1754944e-38, %v307_v31  ;;  %vm306_vm4 = vcmp.eq.f32.partialorder %v305_v32, 8.507059e+37 }
 0x21a   :  { %v325_v24 = vmul.f32 %v1982_v41, %v324_v20 }
 0x21c   :  { %1914 = vmatmul.msk.f32.vlgmr.msra.gmra.mxu3 %vm179_vm11, %v325_v24 }
 0x21d   :  { %v1992_v26 = vpop.eup %1991  ;;  %632 = vmatpush.msra.mxu3 %v2212_v15 }
 0x21e   :  { %v297_v27 = vmul.f32 %v1992_v26, %v292_v13  ;;  %v537_v28 = vpop.xlane.xlu0 %536  ;;  %vm302_vm1 = vweird.f32 %v1992_v26 }
 0x21f   :  { %1993 = vrcp.f32 %v537_v28  ;;  %vm303_vm3 = vmor %vm301_vm2, %vm302_vm1  ;;  %v564_v44 = vand.u32 2147483648, %v537_v28  ;;  %vm558_vm6 = vweird.f32 %v537_v28  ;;  %v562_v46 = vand.u32 2147483647, %v537_v28 }
 0x220   :  { %v298_v29 = vsub.f32 1.0, %v297_v27 }
 0x221   :  { %vm563_vm10 = vcmp.eq.f32.partialorder %v562_v46, 8.507059e+37 }
 0x222   :  { %v299_v30 = vmul.f32 %v1992_v26, %v298_v29 }
 0x224   :  { %v300_v33 = vadd.f32 %v1992_v26, %v299_v30  ;;  %1920 = vmatmul.msk.f32.vlgmr.msrb.gmra.mxu3 %vm93_vm0, %v2241_v22 }
 0x225   :  { %v1994_v34 = vpop.eup %1993  ;;  %726 = vmatpush.msrb.mxu3 %v2164_v0 }
 0x226   :  { %v554_v36 = vmul.f32 %v1994_v34, %v537_v28  ;;  %v197_v37 = vpop.xlane.xlu0 %196  ;;  %v304_v38 = vsel %vm303_vm3, %v1992_v26, %v300_v33  ;;  %vm559_vm5 = vweird.f32 %v1994_v34 }
 0x227   :  { %1995 = vrcp.f32 %v197_v37  ;;  %v309_v39 = vsel %vm306_vm4, %v308_v35, %v304_v38  ;;  %727 = vmatpush.msrb.mxu3 %v2169_v1  ;;  %v224_v47 = vand.u32 2147483648, %v197_v37  ;;  %vm560_vm7 = vmor %vm558_vm6, %vm559_vm5  ;;  %v222_v50 = vand.u32 2147483647, %v197_v37 }
 0x228   :  { %v555_v15 = vsub.f32 1.0, %v554_v36  ;;  %v310_v40 = vmul.f32 %v2260_v48, %v309_v39  ;;  %v373_v48 = vmul.f32 %v2247_v23, %v2217_v17  ;;  %vm218_vm9 = vweird.f32 %v197_v37 }
 0x229   :  { %728 = vmatpush.msrb.mxu3 %v2175_v2  ;;  %v225_v54 = vor.u32 1.1754944e-38, %v224_v47  ;;  %vm223_vm13 = vcmp.eq.f32.partialorder %v222_v50, 8.507059e+37 }
 0x22a   :  { %v556_v41 = vmul.f32 %v1994_v34, %v555_v15  ;;  %1913 = vmatmul.msk.f32.vlgmr.msra.gmra.mxu2 %vm179_vm11, %v310_v40 }
 0x22b   :  { %609 = vmatpush.msra.mxu2 %v2231_v21  ;;  %729 = vmatpush.msrb.mxu3 %v2181_v3  ;;  %v565_v21 = vor.u32 1.1754944e-38, %v564_v44 }
 0x22c   :  { %v557_v43 = vadd.f32 %v1994_v34, %v556_v41 }
 0x22d   :  { %v1996_v22 = vpop.eup %1995 }
 0x22e   :  { %v214_v42 = vmul.f32 %v1996_v22, %v197_v37  ;;  %vm219_vm8 = vweird.f32 %v1996_v22  ;;  %v561_v51 = vsel %vm560_vm7, %v1994_v34, %v557_v43 }
 0x22f   :  { %vm220_vm12 = vmor %vm218_vm9, %vm219_vm8  ;;  %v566_v56 = vsel %vm563_vm10, %v565_v21, %v561_v51 }
 0x230   :  { %v215_v45 = vsub.f32 1.0, %v214_v42  ;;  %v567_v60 = vmul.f32 %v2266_v55, %v566_v56 }
 0x232   :  { %v216_v49 = vmul.f32 %v1996_v22, %v215_v45  ;;  %1918 = vmatmul.msk.f32.vlgmr.msrb.gmra.mxu2 %vm93_vm0, %v373_v48 }
 0x233   :  { %701 = vmatpush.msrb.mxu2 %v373_v48 }
 0x234   :  { %v217_v53 = vadd.f32 %v1996_v22, %v216_v49 }
 0x236   :  { %v221_v57 = vsel %vm220_vm12, %v1996_v22, %v217_v53 }
 0x237   :  { %v226_v58 = vsel %vm223_vm13, %v225_v54, %v221_v57 }
 0x238   :  { %v227_v17 = vmul.f32 %v2272_v59, %v226_v58 }
 0x23a   :  { %1926 = vmatmul.msk.f32.vlgmr.msra.gmra.mxu0 %vm179_vm11, %v227_v17  ;;  %1924 = vmatmul.msk.f32.vlgmr.msra.gmra.mxu2 %vm179_vm11, %v567_v60 }
 0x23b   :  { %1009 = vmatpush.msra.mxu2 %v2164_v0 }
 0x23d   :  { %1010 = vmatpush.msra.mxu2 %v2169_v1 }
 0x23f   :  { %1011 = vmatpush.msra.mxu2 %v2175_v2 }
 0x241   :  { %1012 = vmatpush.msra.mxu2 %v2181_v3  ;;  %v424_v3 = vpop.xlane.xlu1 %423 }
 0x242   :  { %v428_v13 = vsub.f32 %v2264_v52, %v424_v3 }
 0x244   :  { %v430_v16 = vmul.f32 1.442695, %v428_v13 }
 0x29f   :  { %v2298_v61 = vpop.f32.mrf.mxu3 }
 0x2a7   :  { %v492_v62 = vpop.f32.mrf.mxu3 }
 0x2a8   :  { %v518_v63 = vmul.f32 0.35355338, %v492_v62 }
 0x2aa   :  { %v520_v59 = vsel %vm179_vm11, %v518_v63, -inf }
 0x2ab   :  { %521 = vmax.xlane.f32.xlu2 %v520_v59 }
 0x2ad   :  { %v2301_v55 = vpop.f32.mrf.mxu2 }
 0x2b3   :  { %181 = vmax.xlane.f32.xlu2 %v180_v7 }
 0x2b5   :  { %v417_v0 = vpop.f32.mrf.mxu2 }
 0x2b6   :  { %v421_v1 = vmul.f32 0.35355338, %v417_v0 }
 0x2b8   :  { %v425_v2 = vsel %vm179_vm11, %v421_v1, -inf }
 0x2bb   :  { %426 = vmax.xlane.f32.xlu2 %v425_v2 }
 0x31e   :  { %v522_v9 = vpop.xlane.xlu2 %521 }
 0x31f   :  { %v526_v10 = vsub.f32 %v518_v63, %v522_v9 }
 0x321   :  { %v528_v14 = vmul.f32 1.442695, %v526_v10 }
 0x323   :  { %1997 = vpow2.f32 %v528_v14 }
 0x324   :  { %1999 = vpow2.f32 %v430_v16 }
 0x326   :  { %v182_v19 = vpop.xlane.xlu2 %181 }
 0x327   :  { %v186_v20 = vsub.f32 %v177_v6, %v182_v19 }
 0x329   :  { %v1998_v24 = vpop.eup %1997  ;;  %v188_v25 = vmul.f32 1.442695, %v186_v20 }
 0x32a   :  { %v532_v26 = vsel %vm179_vm11, %v1998_v24, 0.0  ;;  %v2308_v28 = vpop.eup %1999 }
 0x32b   :  { %2001 = vpow2.f32 %v188_v25  ;;  %533 = vadd.xlane.f32.xlu1 %v532_v26  ;;  %v434_v52 = vsel %vm179_vm11, %v2308_v28, 0.0 }
 0x32e   :  { %v427_v27 = vpop.xlane.xlu2 %426 }
 0x32f   :  { %v429_v29 = vsub.f32 %v421_v1, %v427_v27 }
 0x331   :  { %v2310_v30 = vpop.eup %2001  ;;  %v432_v31 = vmul.f32 1.442695, %v429_v29 }
 0x332   :  { %v192_v32 = vsel %vm179_vm11, %v2310_v30, 0.0 }
 0x333   :  { %2003 = vpow2.f32 %v432_v31  ;;  %435 = vadd.xlane.f32.xlu1 %v434_v52  ;;  %193 = vadd.xlane.f32.xlu2 %v192_v32  ;;  %v611_v31 = vpop.f32.mrf.mxu2 }
 0x339   :  { %v2316_v33 = vpop.eup %2003 }
 0x33a   :  { %v437_v34 = vsel %vm179_vm11, %v2316_v33, 0.0 }
 0x33b   :  { %438 = vadd.xlane.f32.xlu2 %v437_v34 }
 0x39e   :  { %v534_v35 = vpop.xlane.xlu1 %533 }
 0x39f   :  { %2005 = vrcp.f32 %v534_v35  ;;  %v549_v40 = vand.u32 2147483648, %v534_v35  ;;  %v547_v22 = vand.u32 2147483647, %v534_v35  ;;  %vm543_vm15 = vweird.f32 %v534_v35 }
 0x3a1   :  { %v550_v44 = vor.u32 1.1754944e-38, %v549_v40  ;;  %vm548_vm2 = vcmp.eq.f32.partialorder %v547_v22, 8.507059e+37 }
 0x3a5   :  { %v2006_v36 = vpop.eup %2005 }
 0x3a6   :  { %v539_v37 = vmul.f32 %v2006_v36, %v534_v35  ;;  %v436_v38 = vpop.xlane.xlu1 %435  ;;  %v194_v15 = vpop.xlane.xlu2 %193  ;;  %vm544_vm14 = vweird.f32 %v2006_v36 }
 0x3a7   :  { %2007 = vrcp.f32 %v436_v38  ;;  %vm545_vm1 = vmor %vm543_vm15, %vm544_vm14  ;;  %v451_v21 = vand.u32 2147483648, %v436_v38  ;;  %v449_v57 = vand.u32 2147483647, %v436_v38  ;;  %v209_v58 = vand.u32 2147483648, %v194_v15 }
 0x3a8   :  { %v540_v39 = vsub.f32 1.0, %v539_v37  ;;  %2009 = vrcp.f32 %v194_v15  ;;  %v207_v60 = vand.u32 2147483647, %v194_v15  ;;  %vm445_vm5 = vweird.f32 %v436_v38 }
 0x3a9   :  { %v452_v59 = vor.u32 1.1754944e-38, %v451_v21  ;;  %vm203_vm7 = vweird.f32 %v194_v15  ;;  %vm450_vm8 = vcmp.eq.f32.partialorder %v449_v57, 8.507059e+37  ;;  %v210_v0 = vor.u32 1.1754944e-38, %v209_v58 }
 0x3aa   :  { %v541_v41 = vmul.f32 %v2006_v36, %v540_v39  ;;  %vm208_vm10 = vcmp.eq.f32.partialorder %v207_v60, 8.507059e+37  ;;  %v2352_v60 = vld [vmem:[%s2744_s3 + $0x10] sm:$0xff] }
 0x3ac   :  { %v542_v42 = vadd.f32 %v2006_v36, %v541_v41 }
 0x3ad   :  { %v2008_v43 = vpop.eup %2007 }
 0x3ae   :  { %v2010_v45 = vpop.eup %2009  ;;  %v546_v46 = vsel %vm545_vm1, %v2006_v36, %v542_v42  ;;  %v441_v47 = vmul.f32 %v2008_v43, %v436_v38  ;;  %v439_v48 = vpop.xlane.xlu2 %438  ;;  %vm446_vm3 = vweird.f32 %v2008_v43 }
 0x3af   :  { %v551_v49 = vsel %vm548_vm2, %v550_v44, %v546_v46  ;;  %v199_v50 = vmul.f32 %v2010_v45, %v194_v15  ;;  %2011 = vrcp.f32 %v439_v48  ;;  %vm204_vm4 = vweird.f32 %v2010_v45  ;;  %vm447_vm6 = vmor %vm445_vm5, %vm446_vm3  ;;  %v657_v36 = vpop.f32.mrf.mxu0 }
 0x3b0   :  { %v442_v51 = vsub.f32 1.0, %v441_v47  ;;  %v552_v54 = vmul.f32 %v1998_v24, %v551_v49  ;;  %vm205_vm9 = vmor %vm203_vm7, %vm204_vm4  ;;  %v466_v14 = vand.u32 2147483648, %v439_v48  ;;  %v464_v20 = vand.u32 2147483647, %v439_v48 }
 0x3b1   :  { %v200_v53 = vsub.f32 1.0, %v199_v50  ;;  %vm460_vm13 = vweird.f32 %v439_v48  ;;  %v658_v38 = vadd.f32 %v657_v36, %v2298_v61  ;;  %v2107_v61 = vmov 32.0  }
 0x3b2   :  { %v443_v56 = vmul.f32 %v2008_v43, %v442_v51  ;;  %1923 = vmatmul.msk.f32.vlgmr.msrb.gmra.mxu1 %vm179_vm11, %v552_v54  ;;  %v467_v25 = vor.u32 1.1754944e-38, %v466_v14  ;;  %vm465_vm15 = vcmp.eq.f32.partialorder %v464_v20, 8.507059e+37  ;;  %2013 = vrcp.f32 %v2107_v61  ;;  %v2412_v61 = vld [vmem:[%s2746_s5 + $0x30] sm:$0xff] }
 0x3b3   :  { %v201_v17 = vmul.f32 %v2010_v45, %v200_v53 }
 0x3b4   :  { %v444_v62 = vadd.f32 %v2008_v43, %v443_v56 }
 0x3b5   :  { %v2012_v63 = vpop.eup %2011  ;;  %v202_v6 = vadd.f32 %v2010_v45, %v201_v17  ;;  %v2346_v17 = vld [vmem:[%s2744_s3 + $0x18] sm:$0xff] }
 0x3b6   :  { %v448_v7 = vsel %vm447_vm6, %v2008_v43, %v444_v62  ;;  %v456_v1 = vmul.f32 %v2012_v63, %v439_v48  ;;  %vm461_vm12 = vweird.f32 %v2012_v63  ;;  %812 = vmatpush.msrb.mxu0 %v2346_v17  ;;  %v2358_v62 = vld [vmem:[%s2744_s3 + $0x8] sm:$0xff] }
 0x3b7   :  { %v453_v2 = vsel %vm450_vm8, %v452_v59, %v448_v7  ;;  %v206_v3 = vsel %vm205_vm9, %v2010_v45, %v202_v6  ;;  %vm462_vm14 = vmor %vm460_vm13, %vm461_vm12 }
 0x3b8   :  { %v211_v9 = vsel %vm208_vm10, %v210_v0, %v206_v3  ;;  %v457_v10 = vsub.f32 1.0, %v456_v1  ;;  %v454_v13 = vmul.f32 %v2308_v28, %v453_v2  ;;  %v2014_v45 = vpop.eup %2013  ;;  %813 = vmatpush.msrb.mxu0 %v2352_v60 }
 0x3b9   :  { %v212_v16 = vmul.f32 %v2310_v30, %v211_v9  ;;  %v746_v46 = vmul.f32 32.0, %v2014_v45  ;;  %vm750_vm1 = vweird.f32 %v2014_v45 }
 0x3ba   :  { %v458_v19 = vmul.f32 %v2012_v63, %v457_v10  ;;  %1927 = vmatmul.msk.f32.vlgmr.msra.gmra.mxu1 %vm179_vm11, %v454_v13  ;;  %814 = vmatpush.msrb.mxu0 %v2358_v62 }
 0x3bb   :  { %1925 = vmatmul.msk.f32.vlgmr.msra.gmra.mxu3 %vm179_vm11, %v212_v16  ;;  %v747_v47 = vsub.f32 1.0, %v746_v46 }
 0x3bc   :  { %v459_v24 = vadd.f32 %v2012_v63, %v458_v19 }
 0x3bd   :  { %v748_v48 = vmul.f32 %v2014_v45, %v747_v47 }
 0x3be   :  { %v463_v26 = vsel %vm462_vm14, %v2012_v63, %v459_v24  ;;  %v2364_v63 = vld [vmem:[%s2744_s3] sm:$0xff] }
 0x3bf   :  { %v468_v27 = vsel %vm465_vm15, %v467_v25, %v463_v26  ;;  %v749_v49 = vadd.f32 %v2014_v45, %v748_v48  ;;  %815 = vmatpush.msrb.mxu0 %v2364_v63  ;;  %v2372_v24 = vld [vmem:[%s2748_s7] ss:$0 sm:$0xff]  ;;  %v2421_v48 = vld [vmem:[%s2746_s5 + $0x28] sm:$0xff]  ;;  %vm911_vm15 = vcmask 523264  }
 0x3c0   :  { %v469_v29 = vmul.f32 %v2316_v33, %v468_v27 }
 0x3c2   :  { %1928 = vmatmul.msk.f32.vlgmr.msrb.gmra.mxu2 %vm179_vm11, %v469_v29  ;;  %v2377_v29 = vld [vmem:[%s2749_s8] ss:$0 sm:$0xff] }
 0x42f   :  { %v588_v28 = vpop.f32.mrf.mxu1 }
 0x437   :  { %v680_v30 = vpop.f32.mrf.mxu1 }
 0x438   :  { %v681_v32 = vadd.f32 %v680_v30, %v588_v28 }
 0x43e   :  { %v634_v52 = vpop.f32.mrf.mxu3 }
 0x43f   :  { %v635_v34 = vadd.f32 %v634_v52, %v2301_v55 }
 0x441   :  { %v706_v35 = vadd.f32 %v681_v32, %v635_v34 }
 0x443   :  { %1929 = vmatmul.msk.f32.vlgmr.msrb.gmra.mxu3 %vm93_vm0, %v706_v35 }
 0x445   :  { %v703_v37 = vpop.f32.mrf.mxu2 }
 0x446   :  { %v704_v15 = vadd.f32 %v703_v37, %v611_v31 }
 0x448   :  { %v707_v39 = vadd.f32 %v704_v15, %v658_v38  ;;  %v1979_v38 = vld [vmem:[%s2745_s4] ss:$0 sm:$0xff] }
 0x44b   :  { %1930 = vmatmul.msk.f32.gmra.mxu3 %vm93_vm0, %v707_v39 }
 0x4c6   :  { %v731_v33 = vpop.f32.mrf.mxu3 }
 0x4c7   :  { %v732_v40 = vadd.f32 %v2202_v8, %v731_v33 }
 0x4c9   :  { %v737_v41 = vadd.f32 %v732_v40, %v2187_v4  ;;  %v2337_v4 = vsel %vm750_vm1, %v2014_v45, %v749_v49 }
 0x4cb   :  { %v739_v22 = vsel %vm93_vm0, %v737_v41, 0.0 }
 0x4cc   :  { %740 = vadd.xlane.f32.xlu1 %v739_v22 }
 0x4ce   :  { %v734_v55 = vpop.f32.mrf.mxu3 }
 0x4cf   :  { %v735_v42 = vadd.f32 %v2202_v8, %v734_v55  ;;  %v2404_v55 = vld [vmem:[%s2746_s5 + $0x38] sm:$0xff] }
 0x4d0   :  { %926 = vmatpush.msrb.mxu1 %v2404_v55 }
 0x4d1   :  { %v738_v43 = vadd.f32 %v735_v42, %v2195_v5 }
 0x4d2   :  { %927 = vmatpush.msrb.mxu1 %v2412_v61 }
 0x4d3   :  { %v742_v44 = vsel %vm93_vm0, %v738_v43, 0.0 }
 0x4d4   :  { %743 = vadd.xlane.f32.xlu2 %v742_v44  ;;  %928 = vmatpush.msrb.mxu1 %v2421_v48 }
 0x53f   :  { %v741_v50 = vpop.xlane.xlu1 %740 }
 0x540   :  { %v752_v51 = vmul.f32 %v2337_v4, %v741_v50 }
 0x542   :  { %v754_v21 = vsub.f32 %v737_v41, %v752_v51 }
 0x544   :  { %v756_v8 = vmul.f32 %v754_v21, %v754_v21 }
 0x546   :  { %v758_v5 = vsel %vm93_vm0, %v756_v8, 0.0 }
 0x547   :  { %759 = vadd.xlane.f32.xlu0 %v758_v5  ;;  %v744_v53 = vpop.xlane.xlu2 %743 }
 0x548   :  { %v753_v54 = vmul.f32 %v2337_v4, %v744_v53 }
 0x54a   :  { %v755_v56 = vsub.f32 %v738_v43, %v753_v54  ;;  %v2435_v54 = vld [vmem:[%s2746_s5 + $0x18] sm:$0xff] }
 0x54c   :  { %v757_v57 = vmul.f32 %v755_v56, %v755_v56 }
 0x54e   :  { %v761_v58 = vsel %vm93_vm0, %v757_v57, 0.0 }
 0x54f   :  { %762 = vadd.xlane.f32.xlu1 %v761_v58 }
 0x5ba   :  { %v760_v59 = vpop.xlane.xlu0 %759 }
 0x5bb   :  { %v764_v6 = vmul.f32 %v760_v59, %v2337_v4  ;;  %v2441_v59 = vld [vmem:[%s2746_s5 + $0x10] sm:$0xff] }
 0x5bd   :  { %v766_v7 = vadd.f32 1e-05, %v764_v6 }
 0x5bf   :  { %2015 = vrsqrt.f32 %v766_v7  ;;  %vm774_vm3 = vweird.f32 %v766_v7 }
 0x5c2   :  { %v763_v0 = vpop.xlane.xlu1 %762 }
 0x5c3   :  { %v765_v1 = vmul.f32 %v763_v0, %v2337_v4 }
 0x5c5   :  { %v2016_v2 = vpop.eup %2015  ;;  %v767_v3 = vadd.f32 1e-05, %v765_v1 }
 0x5c6   :  { %v769_v9 = vmul.f32 %v2016_v2, %v766_v7  ;;  %vm775_vm2 = vweird.f32 %v2016_v2 }
 0x5c7   :  { %2017 = vrsqrt.f32 %v767_v3  ;;  %vm776_vm4 = vmor %vm774_vm3, %vm775_vm2  ;;  %vm784_vm6 = vweird.f32 %v767_v3 }
 0x5c8   :  { %v770_v10 = vmul.f32 %v2016_v2, %v769_v9 }
 0x5ca   :  { %v771_v13 = vmul.f32 0.5, %v770_v10 }
 0x5cc   :  { %v772_v14 = vsub.f32 1.5, %v771_v13  ;;  %v2453_v13 = vld [vmem:[%s2746_s5] sm:$0xff] }
 0x5cd   :  { %v2018_v16 = vpop.eup %2017 }
 0x5ce   :  { %v773_v19 = vmul.f32 %v2016_v2, %v772_v14  ;;  %v779_v20 = vmul.f32 %v2018_v16, %v767_v3  ;;  %vm785_vm5 = vweird.f32 %v2018_v16 }
 0x5cf   :  { %vm786_vm7 = vmor %vm784_vm6, %vm785_vm5 }
 0x5d0   :  { %v777_v25 = vsel %vm776_vm4, %v2016_v2, %v773_v19  ;;  %v780_v26 = vmul.f32 %v2018_v16, %v779_v20  ;;  %v2447_v2 = vld [vmem:[%s2746_s5 + $0x8] sm:$0xff] }
 0x5d1   :  { %v788_v27 = vmul.f32 %v777_v25, %v754_v21  ;;  %v2429_v21 = vld [vmem:[%s2746_s5 + $0x20] sm:$0xff] }
 0x5d2   :  { %v781_v28 = vmul.f32 0.5, %v780_v26  ;;  %929 = vmatpush.msrb.mxu1 %v2429_v21 }
 0x5d3   :  { %v790_v30 = vmul.f32 %v2372_v24, %v788_v27 }
 0x5d4   :  { %v782_v31 = vsub.f32 1.5, %v781_v28  ;;  %930 = vmatpush.msrb.mxu1 %v2435_v54 }
 0x5d5   :  { %v2381_v52 = vadd.f32 %v2377_v29, %v790_v30 }
 0x5d6   :  { %v783_v32 = vmul.f32 %v2018_v16, %v782_v31  ;;  %931 = vmatpush.msrb.mxu1 %v2441_v59 }
 0x5d7   :  { %1931 = vmatmul.msk.f32.vlgmr.msrb.gmra.mxu0 %vm93_vm0, %v2381_v52 }
 0x5d8   :  { %v787_v34 = vsel %vm786_vm7, %v2018_v16, %v783_v32  ;;  %932 = vmatpush.msrb.mxu1 %v2447_v2 }
 0x5d9   :  { %v789_v35 = vmul.f32 %v787_v34, %v755_v56 }
 0x5da   :  { %933 = vmatpush.msrb.mxu1 %v2453_v13 }
 0x5db   :  { %v791_v36 = vmul.f32 %v2372_v24, %v789_v35 }
 0x5dd   :  { %v2387_v37 = vadd.f32 %v2377_v29, %v791_v36 }
 0x5df   :  { %1932 = vmatmul.msk.f32.gmra.mxu0 %vm93_vm0, %v2387_v37 }
 0x654   :  { %v817_v15 = vpop.f32.mrf.mxu0 }
 0x655   :  { %v2394_v39 = vadd.f32 %v1979_v38, %v817_v15 }
 0x657   :  { %v2397_v33 = vmul.f32 0.70710677, %v2394_v39 }
 0x659   :  { %v827_v40 = vmul.f32 %v2397_v33, %v2397_v33 }
 0x65b   :  { %v828_v41 = vmin.f32 %v827_v40, 16.0 }
 0x65c   :  { %v820_v22 = vpop.f32.mrf.mxu0 }
 0x65d   :  { %v829_v42 = vmul.f32 2.1237322e-06, %v828_v41  ;;  %v840_v43 = vmul.f32 3.8918573e-05, %v828_v41  ;;  %v2406_v44 = vadd.f32 %v1979_v38, %v820_v22 }
 0x65f   :  { %v830_v45 = vadd.f32 0.00028619796, %v829_v42  ;;  %v841_v46 = vadd.f32 0.001143296, %v840_v43  ;;  %v2416_v47 = vmul.f32 0.70710677, %v2406_v44 }
 0x661   :  { %v831_v49 = vmul.f32 %v830_v45, %v828_v41  ;;  %v842_v50 = vmul.f32 %v841_v46, %v828_v41  ;;  %v867_v51 = vmul.f32 %v2416_v47, %v2416_v47 }
 0x663   :  { %v843_v8 = vadd.f32 0.014752088, %v842_v50  ;;  %v832_v5 = vadd.f32 0.0036580483, %v831_v49  ;;  %v868_v53 = vmin.f32 %v867_v51, 16.0 }
 0x665   :  { %v844_v56 = vmul.f32 %v843_v8, %v828_v41  ;;  %v869_v57 = vmul.f32 2.1237322e-06, %v868_v53  ;;  %v880_v58 = vmul.f32 3.8918573e-05, %v868_v53  ;;  %v833_v7 = vmul.f32 %v832_v5, %v828_v41 }
 0x667   :  { %v845_v6 = vadd.f32 0.112945676, %v844_v56  ;;  %v870_v0 = vadd.f32 0.00028619796, %v869_v57  ;;  %v881_v1 = vadd.f32 0.001143296, %v880_v58 }
 0x668   :  { %v834_v16 = vadd.f32 0.05243302, %v833_v7 }
 0x669   :  { %v846_v3 = vmul.f32 %v845_v6, %v828_v41  ;;  %v871_v9 = vmul.f32 %v870_v0, %v868_v53  ;;  %v882_v10 = vmul.f32 %v881_v1, %v868_v53 }
 0x66a   :  { %v835_v28 = vmul.f32 %v834_v16, %v828_v41 }
 0x66b   :  { %v847_v14 = vadd.f32 0.4994258, %v846_v3  ;;  %v883_v19 = vadd.f32 0.014752088, %v882_v10  ;;  %v872_v25 = vadd.f32 0.0036580483, %v871_v9 }
 0x66c   :  { %v836_v34 = vadd.f32 0.18741608, %v835_v28 }
 0x66d   :  { %v848_v20 = vmul.f32 %v847_v14, %v828_v41  ;;  %v884_v26 = vmul.f32 %v883_v19, %v868_v53  ;;  %v873_v31 = vmul.f32 %v872_v25, %v868_v53 }
 0x66e   :  { %v837_v40 = vmul.f32 %v836_v34, %v828_v41  ;;  %v824_v34 = vmul.f32 0.5, %v2406_v44 }
 0x66f   :  { %v849_v27 = vadd.f32 1.0, %v848_v20  ;;  %v885_v30 = vadd.f32 0.112945676, %v884_v26  ;;  %v874_v36 = vadd.f32 0.05243302, %v873_v31  ;;  %v823_v20 = vmul.f32 0.5, %v2394_v39 }
 0x670   :  { %v838_v49 = vadd.f32 1.1283791, %v837_v40 }
 0x671   :  { %2019 = vrcp.f32 %v849_v27  ;;  %v886_v32 = vmul.f32 %v885_v30, %v868_v53  ;;  %v875_v43 = vmul.f32 %v874_v36, %v868_v53  ;;  %v861_v46 = vand.u32 2147483648, %v849_v27  ;;  %v1980_v36 = vld [vmem:[%s2747_s6] ss:$0 sm:$0xff] }
 0x672   :  { %v859_v51 = vand.u32 2147483647, %v849_v27  ;;  %vm855_vm9 = vweird.f32 %v849_v27  ;;  %v839_v58 = vmul.f32 %v838_v49, %v2397_v33 }
 0x673   :  { %v887_v35 = vadd.f32 0.4994258, %v886_v32  ;;  %v876_v8 = vadd.f32 0.18741608, %v875_v43  ;;  %v862_v56 = vor.u32 1.1754944e-38, %v861_v46 }
 0x674   :  { %vm860_vm12 = vcmp.eq.f32.partialorder %v859_v51, 8.507059e+37 }
 0x675   :  { %v888_v38 = vmul.f32 %v887_v35, %v868_v53  ;;  %v877_v7 = vmul.f32 %v876_v8, %v868_v53 }
 0x677   :  { %v2020_v15 = vpop.eup %2019  ;;  %v889_v42 = vadd.f32 1.0, %v888_v38  ;;  %v878_v14 = vadd.f32 1.1283791, %v877_v7 }
 0x678   :  { %v851_v22 = vmul.f32 %v2020_v15, %v849_v27  ;;  %vm856_vm8 = vweird.f32 %v2020_v15 }
 0x679   :  { %2021 = vrcp.f32 %v889_v42  ;;  %vm857_vm10 = vmor %vm855_vm9, %vm856_vm8  ;;  %v901_v10 = vand.u32 2147483648, %v889_v42  ;;  %v899_v19 = vand.u32 2147483647, %v889_v42  ;;  %vm895_vm14 = vweird.f32 %v889_v42 }
 0x67a   :  { %v852_v45 = vsub.f32 1.0, %v851_v22  ;;  %v879_v53 = vmul.f32 %v878_v14, %v2416_v47 }
 0x67b   :  { %v902_v27 = vor.u32 1.1754944e-38, %v901_v10  ;;  %vm900_vm2 = vcmp.eq.f32.partialorder %v899_v19, 8.507059e+37 }
 0x67c   :  { %v853_v50 = vmul.f32 %v2020_v15, %v852_v45 }
 0x67e   :  { %v854_v5 = vadd.f32 %v2020_v15, %v853_v50 }
 0x67f   :  { %v2022_v57 = vpop.eup %2021 }
 0x680   :  { %v858_v6 = vsel %vm857_vm10, %v2020_v15, %v854_v5  ;;  %v891_v0 = vmul.f32 %v2022_v57, %v889_v42  ;;  %vm896_vm13 = vweird.f32 %v2022_v57 }
 0x681   :  { %v863_v41 = vsel %vm860_vm12, %v862_v56, %v858_v6  ;;  %vm897_vm1 = vmor %vm895_vm14, %vm896_vm13 }
 0x682   :  { %v864_v1 = vmul.f32 %v863_v41, %v839_v58  ;;  %v892_v3 = vsub.f32 1.0, %v891_v0 }
 0x684   :  { %v1933_v9 = vclamps-f32 %v864_v1, 1.0  ;;  %v893_v16 = vmul.f32 %v2022_v57, %v892_v3 }
 0x686   :  { %v907_v25 = vadd.f32 1.0, %v1933_v9  ;;  %v894_v26 = vadd.f32 %v2022_v57, %v893_v16 }
 0x688   :  { %v909_v33 = vmul.f32 %v907_v25, %v823_v20  ;;  %v898_v28 = vsel %vm897_vm1, %v2022_v57, %v894_v26 }
 0x689   :  { %v903_v30 = vsel %vm900_vm2, %v902_v27, %v898_v28 }
 0x68a   :  { %1935 = vmatmul.msk.f32.vlgmr.msrb.gmra.mxu1 %vm911_vm15, %v909_v33  ;;  %v904_v31 = vmul.f32 %v903_v30, %v879_v53 }
 0x68c   :  { %v1934_v32 = vclamps-f32 %v904_v31, 1.0 }
 0x68e   :  { %v908_v35 = vadd.f32 1.0, %v1934_v32 }
 0x690   :  { %v910_v39 = vmul.f32 %v908_v35, %v824_v34 }
 0x692   :  { %1936 = vmatmul.msk.f32.gmra.mxu1 %vm911_vm15, %v910_v39 }
 0x707   :  { %v935_v38 = vpop.f32.mrf.mxu1 }
 0x708   :  { %v936_v15 = vadd.f32 %v1980_v36, %v935_v38  ;;  %v2490_v38 = vld [vmem:[%s2743_s2] ss:$0 sm:$0xff] }
 0x70a   :  { %v941_v47 = vadd.f32 %v936_v15, %v2381_v52 }
 0x70c   :  { %v943_v40 = vsel %vm93_vm0, %v941_v47, 0.0 }
 0x70d   :  { %944 = vadd.xlane.f32.xlu2 %v943_v40 }
 0x70f   :  { %v938_v22 = vpop.f32.mrf.mxu1 }
 0x710   :  { %v939_v42 = vadd.f32 %v1980_v36, %v938_v22 }
 0x712   :  { %v942_v43 = vadd.f32 %v939_v42, %v2387_v37 }
 0x714   :  { %v946_v44 = vsel %vm93_vm0, %v942_v43, 0.0 }
 0x715   :  { %947 = vadd.xlane.f32.xlu0 %v946_v44 }
 0x780   :  { %v945_v45 = vpop.xlane.xlu2 %944 }
 0x781   :  { %v949_v46 = vmul.f32 %v945_v45, %v2337_v4 }
 0x783   :  { %v951_v49 = vsub.f32 %v941_v47, %v949_v46 }
 0x785   :  { %v953_v50 = vmul.f32 %v951_v49, %v951_v49 }
 0x787   :  { %v955_v51 = vsel %vm93_vm0, %v953_v50, 0.0 }
 0x788   :  { %956 = vadd.xlane.f32.xlu1 %v955_v51  ;;  %v948_v8 = vpop.xlane.xlu0 %947 }
 0x789   :  { %v950_v52 = vmul.f32 %v948_v8, %v2337_v4 }
 0x78b   :  { %v952_v5 = vsub.f32 %v942_v43, %v950_v52 }
 0x78d   :  { %v954_v56 = vmul.f32 %v952_v5, %v952_v5 }
 0x78f   :  { %v958_v57 = vsel %vm93_vm0, %v954_v56, 0.0 }
 0x790   :  { %959 = vadd.xlane.f32.xlu2 %v958_v57 }
 0x7fb   :  { %v957_v37 = vpop.xlane.xlu1 %956 }
 0x7fc   :  { %v961_v58 = vmul.f32 %v957_v37, %v2337_v4 }
 0x7fe   :  { %v963_v6 = vadd.f32 1e-05, %v961_v58 }
 0x800   :  { %2023 = vrsqrt.f32 %v963_v6  ;;  %vm971_vm4 = vweird.f32 %v963_v6 }
 0x803   :  { %v960_v41 = vpop.xlane.xlu2 %959 }
 0x804   :  { %v962_v7 = vmul.f32 %v960_v41, %v2337_v4 }
 0x806   :  { %v2024_v0 = vpop.eup %2023  ;;  %v964_v3 = vadd.f32 1e-05, %v962_v7 }
 0x807   :  { %v966_v1 = vmul.f32 %v2024_v0, %v963_v6  ;;  %vm972_vm3 = vweird.f32 %v2024_v0 }
 0x808   :  { %2025 = vrsqrt.f32 %v964_v3  ;;  %vm973_vm5 = vmor %vm971_vm4, %vm972_vm3  ;;  %vm981_vm7 = vweird.f32 %v964_v3 }
 0x809   :  { %v967_v9 = vmul.f32 %v2024_v0, %v966_v1 }
 0x80b   :  { %v968_v10 = vmul.f32 0.5, %v967_v9 }
 0x80d   :  { %v969_v14 = vsub.f32 1.5, %v968_v10 }
 0x80e   :  { %v2026_v16 = vpop.eup %2025 }
 0x80f   :  { %v970_v19 = vmul.f32 %v2024_v0, %v969_v14  ;;  %v976_v20 = vmul.f32 %v2026_v16, %v964_v3  ;;  %vm982_vm6 = vweird.f32 %v2026_v16 }
 0x810   :  { %vm983_vm8 = vmor %vm981_vm7, %vm982_vm6 }
 0x811   :  { %v974_v25 = vsel %vm973_vm5, %v2024_v0, %v970_v19  ;;  %v977_v33 = vmul.f32 %v2026_v16, %v976_v20 }
 0x812   :  { %v985_v26 = vmul.f32 %v974_v25, %v951_v49 }
 0x813   :  { %v978_v53 = vmul.f32 0.5, %v977_v33 }
 0x814   :  { %v987_v27 = vmul.f32 %v2372_v24, %v985_v26 }
 0x815   :  { %v979_v28 = vsub.f32 1.5, %v978_v53 }
 0x816   :  { %v2477_v30 = vadd.f32 %v2377_v29, %v987_v27 }
 0x817   :  { %v980_v31 = vmul.f32 %v2026_v16, %v979_v28 }
 0x818   :  { %1937 = vmatmul.msk.f32.vlgmr.msra.gmra.mxu2 %vm93_vm0, %v2477_v30 }
 0x819   :  { %v984_v32 = vsel %vm983_vm8, %v2026_v16, %v980_v31 }
 0x81a   :  { %v986_v34 = vmul.f32 %v984_v32, %v952_v5 }
 0x81c   :  { %v988_v35 = vmul.f32 %v2372_v24, %v986_v34 }
 0x81e   :  { %v2483_v39 = vadd.f32 %v2377_v29, %v988_v35 }
 0x820   :  { %1938 = vmatmul.msk.f32.gmra.mxu2 %vm93_vm0, %v2483_v39 }
 0x89b   :  { %v1014_v36 = vpop.f32.mrf.mxu2 }
 0x89c   :  { %v1015_v15 = vadd.f32 %v2490_v38, %v1014_v36 }
 0x89e   :  { %1939 = vmatpush.xpose.msk.msra.mxu3 %vm93_vm0, %v1015_v15  ;;  %1943 = vmatpush.xpose.msk.msrb.mxu2 %vm93_vm0, %v1015_v15  ;;  %v2496_v24 = vmul.f32 %v2206_v12, %v1015_v15  ;;  %v1124_v29 = vmul.f32 %v2204_v11, %v1015_v15  ;;  %v2501_v47 = vmul.f32 %v2219_v18, %v1015_v15 }
 0x89f   :  { %v1268_v44 = vmul.f32 %v2247_v23, %v1015_v15 }
 0x8a1   :  { %1940 = vmatmul.msk.f32.vlgmr.msra.gmra.mxu3 %vm93_vm0, %v2496_v24  ;;  %1944 = vmatmul.msk.f32.vlgmr.msrb.gmra.mxu2 %vm93_vm0, %v1124_v29 }
 0x8a2   :  { %1949 = vmatpush.xpose.msk.msra.mxu2 %vm93_vm0, %v1015_v15 }
 0x8a3   :  { %v1017_v40 = vpop.f32.mrf.mxu2 }
 0x8a4   :  { %v1018_v22 = vadd.f32 %v2490_v38, %v1017_v40 }
 0x8a6   :  { %1482 = vmatpush.msrb.mxu2 %v2501_v47  ;;  %1941 = vmatpush.xpose.msk.msra.mxu0 %vm93_vm0, %v1018_v22  ;;  %v1125_v42 = vmul.f32 %v2204_v11, %v1018_v22  ;;  %v2512_v43 = vmul.f32 %v2206_v12, %v1018_v22  ;;  %v2521_v45 = vmul.f32 %v2219_v18, %v1018_v22 }
 0x8a7   :  { %1945 = vmatpush.xpose.msk.msrb.mxu3 %vm93_vm0, %v1018_v22  ;;  %v1269_v11 = vmul.f32 %v2247_v23, %v1018_v22 }
 0x8a8   :  { %1263 = vmatpush.msra.mxu1 %v1125_v42 }
 0x8a9   :  { %1950 = vmatmul.msk.f32.vlgmr.msra.gmra.mxu2 %vm93_vm0, %v1268_v44  ;;  %1942 = vmatmul.msk.f32.vlgmr.msra.gmra.mxu0 %vm93_vm0, %v2512_v43 }
 0x8aa   :  { %1240 = vmatpush.msrb.mxu0 %v1124_v29  ;;  %1946 = vmatmul.msk.f32.vlgmr.msrb.gmra.mxu3 %vm93_vm0, %v1125_v42 }
 0x8ab   :  { %1951 = vmatpush.xpose.msk.msra.mxu3 %vm93_vm0, %v1018_v22  ;;  %1955 = vmatpush.xpose.msk.msrb.mxu1 %vm93_vm0, %v1018_v22 }
 0x8ac   :  { %1574 = vmatpush.msra.mxu2 %v1268_v44  ;;  %1953 = vmatpush.xpose.msk.msra.mxu0 %vm93_vm0, %v1015_v15 }
 0x8af   :  { %1505 = vmatpush.msrb.mxu3 %v2521_v45 }
 0x8b2   :  { %1952 = vmatmul.msk.f32.vlgmr.msra.gmra.mxu3 %vm93_vm0, %v1269_v11 }
 0x8b3   :  { %1597 = vmatpush.msra.mxu3 %v1269_v11 }
 0x924   :  { %v2528_v12 = vpop.f32.mrf.mxu3  ;;  %v1146_v46 = vpop.f32.mrf.mxu2 }
 0x925   :  { %v1172_v49 = vmul.f32 0.35355338, %v1146_v46 }
 0x927   :  { %v1174_v50 = vsel %vm179_vm11, %v1172_v49, -inf }
 0x928   :  { %1175 = vmax.xlane.f32.xlu0 %v1174_v50 }
 0x92c   :  { %v1290_v41 = vpop.f32.mrf.mxu2 }
 0x92d   :  { %v1169_v18 = vpop.f32.mrf.mxu3  ;;  %v1316_v7 = vmul.f32 0.35355338, %v1290_v41  ;;  %v2075_v41 = vld [vmem:[%s2742_s1] sm:$0xff] }
 0x92e   :  { %v1173_v51 = vmul.f32 0.35355338, %v1169_v18 }
 0x92f   :  { %v1318_v1 = vsel %vm179_vm11, %v1316_v7, -inf }
 0x930   :  { %v1177_v8 = vsel %vm179_vm11, %v1173_v51, -inf }
 0x931   :  { %1178 = vmax.xlane.f32.xlu1 %v1177_v8 }
 0x935   :  { %v1313_v3 = vpop.f32.mrf.mxu3 }
 0x936   :  { %v1317_v10 = vmul.f32 0.35355338, %v1313_v3 }
 0x938   :  { %v1321_v14 = vsel %vm179_vm11, %v1317_v10, -inf }
 0x99b   :  { %v1176_v52 = vpop.xlane.xlu0 %1175 }
 0x99c   :  { %v1180_v5 = vsub.f32 %v1172_v49, %v1176_v52 }
 0x99e   :  { %v1182_v56 = vmul.f32 1.442695, %v1180_v5 }
 0x9a0   :  { %2027 = vpow2.f32 %v1182_v56 }
 0x9a4   :  { %v1179_v23 = vpop.xlane.xlu1 %1178 }
 0x9a5   :  { %v1181_v57 = vsub.f32 %v1173_v51, %v1179_v23 }
 0x9a6   :  { %v2028_v37 = vpop.eup %2027 }
 0x9a7   :  { %v1184_v58 = vmul.f32 1.442695, %v1181_v57  ;;  %v1186_v6 = vsel %vm179_vm11, %v2028_v37, 0.0 }
 0x9a8   :  { %1187 = vadd.xlane.f32.xlu2 %v1186_v6  ;;  %v2073_v6 = vld [vmem:[%s2742_s1 + $0x10] sm:$0xff] }
 0x9a9   :  { %2029 = vpow2.f32 %v1184_v58 }
 0x9af   :  { %v2030_v0 = vpop.eup %2029 }
 0x9b0   :  { %1319 = vmax.xlane.f32.xlu2 %v1318_v1  ;;  %v1189_v9 = vsel %vm179_vm11, %v2030_v0, 0.0 }
 0x9b1   :  { %1190 = vadd.xlane.f32.xlu0 %v1189_v9 }
 0x9b8   :  { %1322 = vmax.xlane.f32.xlu2 %v1321_v14 }
 0xa1b   :  { %v1188_v16 = vpop.xlane.xlu2 %1187 }
 0xa1c   :  { %2031 = vrcp.f32 %v1188_v16  ;;  %v1203_v53 = vand.u32 2147483648, %v1188_v16  ;;  %v1201_v32 = vand.u32 2147483647, %v1188_v16  ;;  %vm1197_vm10 = vweird.f32 %v1188_v16 }
 0xa1e   :  { %v1204_v35 = vor.u32 1.1754944e-38, %v1203_v53  ;;  %vm1202_vm13 = vcmp.eq.f32.partialorder %v1201_v32, 8.507059e+37 }
 0xa22   :  { %v2032_v19 = vpop.eup %2031 }
 0xa23   :  { %v1193_v20 = vmul.f32 %v2032_v19, %v1188_v16  ;;  %v1320_v25 = vpop.xlane.xlu2 %1319  ;;  %vm1198_vm9 = vweird.f32 %v2032_v19 }
 0xa24   :  { %v1324_v26 = vsub.f32 %v1316_v7, %v1320_v25  ;;  %v1191_v33 = vpop.xlane.xlu0 %1190  ;;  %vm1199_vm12 = vmor %vm1197_vm10, %vm1198_vm9 }
 0xa25   :  { %v1194_v27 = vsub.f32 1.0, %v1193_v20  ;;  %2033 = vrcp.f32 %v1191_v33  ;;  %v1218_v50 = vand.u32 2147483648, %v1191_v33  ;;  %v1216_v8 = vand.u32 2147483647, %v1191_v33 }
 0xa26   :  { %v1326_v28 = vmul.f32 1.442695, %v1324_v26  ;;  %vm1212_vm1 = vweird.f32 %v1191_v33 }
 0xa27   :  { %v1195_v31 = vmul.f32 %v2032_v19, %v1194_v27  ;;  %v1219_v5 = vor.u32 1.1754944e-38, %v1218_v50  ;;  %vm1217_vm3 = vcmp.eq.f32.partialorder %v1216_v8, 8.507059e+37 }
 0xa28   :  { %2035 = vpow2.f32 %v1326_v28 }
 0xa29   :  { %v1196_v34 = vadd.f32 %v2032_v19, %v1195_v31 }
 0xa2b   :  { %v2034_v36 = vpop.eup %2033  ;;  %v1200_v15 = vsel %vm1199_vm12, %v2032_v19, %v1196_v34  ;;  %v1323_v29 = vpop.xlane.xlu2 %1322 }
 0xa2c   :  { %v1205_v40 = vsel %vm1202_vm13, %v1204_v35, %v1200_v15  ;;  %v1208_v22 = vmul.f32 %v2034_v36, %v1191_v33  ;;  %v1325_v42 = vsub.f32 %v1317_v10, %v1323_v29  ;;  %vm1213_vm14 = vweird.f32 %v2034_v36 }
 0xa2d   :  { %v1206_v44 = vmul.f32 %v2028_v37, %v1205_v40  ;;  %vm1214_vm2 = vmor %vm1212_vm1, %vm1213_vm14 }
 0xa2e   :  { %v2536_v11 = vpop.eup %2035  ;;  %v1209_v46 = vsub.f32 1.0, %v1208_v22  ;;  %v1328_v49 = vmul.f32 1.442695, %v1325_v42 }
 0xa2f   :  { %1947 = vmatmul.msk.f32.vlgmr.msrb.gmra.mxu0 %vm179_vm11, %v1206_v44  ;;  %v1330_v18 = vsel %vm179_vm11, %v2536_v11, 0.0 }
 0xa30   :  { %v1210_v51 = vmul.f32 %v2034_v36, %v1209_v46  ;;  %2037 = vpow2.f32 %v1328_v49  ;;  %1528 = vmatpush.msrb.mxu0 %v2496_v24  ;;  %1331 = vadd.xlane.f32.xlu2 %v1330_v18  ;;  %v2072_v24 = vld [vmem:[%s2742_s1 + $0x18] sm:$0xff] }
 0xa32   :  { %v1211_v52 = vadd.f32 %v2034_v36, %v1210_v51 }
 0xa34   :  { %v1215_v56 = vsel %vm1214_vm2, %v2034_v36, %v1211_v52 }
 0xa35   :  { %v1220_v23 = vsel %vm1217_vm3, %v1219_v5, %v1215_v56 }
 0xa36   :  { %v2542_v57 = vpop.eup %2037  ;;  %v1221_v37 = vmul.f32 %v2030_v0, %v1220_v23 }
 0xa37   :  { %1954 = vmatmul.msk.f32.vlgmr.msra.gmra.mxu0 %vm93_vm0, %v2501_v47  ;;  %v1333_v58 = vsel %vm179_vm11, %v2542_v57, 0.0  ;;  %v2074_v47 = vld [vmem:[%s2742_s1 + $0x8] sm:$0xff] }
 0xa38   :  { %1948 = vmatmul.msk.f32.vlgmr.msra.gmra.mxu1 %vm179_vm11, %v1221_v37  ;;  %1334 = vadd.xlane.f32.xlu2 %v1333_v58 }
 0xa39   :  { %1551 = vmatpush.msra.mxu1 %v2512_v43  ;;  %1622 = vmatpush.msra.mxu0 %v2072_v24  ;;  %v1071_v43 = vpop.f32.mrf.mxu0 }
 0xa3b   :  { %1623 = vmatpush.msra.mxu0 %v2073_v6 }
 0xa3d   :  { %1624 = vmatpush.msra.mxu0 %v2074_v47 }
 0xa3f   :  { %1625 = vmatpush.msra.mxu0 %v2075_v41 }
 0xa40   :  { %1956 = vmatmul.msk.f32.vlgmr.msrb.gmra.mxu1 %vm93_vm0, %v2521_v45  ;;  %v1074_v45 = vmul.f32 0.35355338, %v2528_v12 }
 0xa41   :  { %1701 = vmatpush.msrb.mxu1 %v2346_v17 }
 0xa43   :  { %1702 = vmatpush.msrb.mxu1 %v2352_v60  ;;  %v1076_v60 = vsel %vm179_vm11, %v1074_v45, -inf }
 0xa45   :  { %1703 = vmatpush.msrb.mxu1 %v2358_v62 }
 0xa47   :  { %1704 = vmatpush.msrb.mxu1 %v2364_v63  ;;  %v1075_v63 = vmul.f32 0.35355338, %v1071_v43 }
 0xa49   :  { %v1079_v14 = vsel %vm179_vm11, %v1075_v63, -inf }
 0xaa3   :  { %v1332_v44 = vpop.xlane.xlu2 %1331 }
 0xaa4   :  { %vm1341_vm8 = vweird.f32 %v1332_v44 }
 0xaab   :  { %v2595_v49 = vpop.xlane.xlu2 %1334 }
 0xaac   :  { %v2568_v7 = vpop.f32.mrf.mxu0 }
 0xab4   :  { %v1388_v0 = vpop.f32.mrf.mxu0 }
 0xab5   :  { %v2570_v1 = vpop.f32.mrf.mxu1  ;;  %v1414_v3 = vmul.f32 0.35355338, %v1388_v0 }
 0xab7   :  { %v1416_v9 = vsel %vm179_vm11, %v1414_v3, -inf }
 0xab8   :  { %1417 = vmax.xlane.f32.xlu1 %v1416_v9 }
 0xabd   :  { %v1411_v10 = vpop.f32.mrf.mxu1 }
 0xabe   :  { %v1415_v17 = vmul.f32 0.35355338, %v1411_v10 }
 0xac0   :  { %v1419_v62 = vsel %vm179_vm11, %v1415_v17, -inf  ;;  %1077 = vmax.xlane.f32.xlu1 %v1076_v60 }
 0xac1   :  { %1420 = vmax.xlane.f32.xlu0 %v1419_v62 }
 0xac9   :  { %1080 = vmax.xlane.f32.xlu0 %v1079_v14 }
 0xb2b   :  { %v1418_v16 = vpop.xlane.xlu1 %1417 }
 0xb2c   :  { %v1422_v19 = vsub.f32 %v1414_v3, %v1418_v16 }
 0xb2e   :  { %v1424_v20 = vmul.f32 1.442695, %v1422_v19 }
 0xb30   :  { %2039 = vpow2.f32 %v1424_v20 }
 0xb33   :  { %v1078_v25 = vpop.xlane.xlu1 %1077 }
 0xb34   :  { %v1421_v26 = vpop.xlane.xlu0 %1420  ;;  %v1082_v33 = vsub.f32 %v1074_v45, %v1078_v25  ;;  %v1345_v25 = vand.u32 2147483647, %v1332_v44 }
 0xb35   :  { %v1423_v12 = vsub.f32 %v1415_v17, %v1421_v26 }
 0xb36   :  { %v2577_v27 = vpop.eup %2039  ;;  %v1084_v53 = vmul.f32 1.442695, %v1082_v33  ;;  %vm1346_vm14 = vcmp.eq.f32.partialorder %v1345_v25, 8.507059e+37 }
 0xb37   :  { %v1426_v28 = vmul.f32 1.442695, %v1423_v12  ;;  %v1428_v31 = vsel %vm179_vm11, %v2577_v27, 0.0 }
 0xb38   :  { %2041 = vpow2.f32 %v1084_v53  ;;  %1429 = vadd.xlane.f32.xlu1 %v1428_v31 }
 0xb39   :  { %2043 = vpow2.f32 %v1426_v28 }
 0xb3c   :  { %v1081_v32 = vpop.xlane.xlu0 %1080 }
 0xb3d   :  { %v1083_v34 = vsub.f32 %v1075_v63, %v1081_v32  ;;  %v1347_v63 = vand.u32 2147483648, %v1332_v44 }
 0xb3e   :  { %v2581_v35 = vpop.eup %2041 }
 0xb3f   :  { %v2583_v36 = vpop.eup %2043  ;;  %v1086_v15 = vmul.f32 1.442695, %v1083_v34  ;;  %v1088_v29 = vsel %vm179_vm11, %v2581_v35, 0.0 }
 0xb40   :  { %1089 = vadd.xlane.f32.xlu1 %v1088_v29  ;;  %v1431_v40 = vsel %vm179_vm11, %v2583_v36, 0.0 }
 0xb41   :  { %2045 = vpow2.f32 %v1086_v15  ;;  %1432 = vadd.xlane.f32.xlu0 %v1431_v40  ;;  %v1348_v15 = vor.u32 1.1754944e-38, %v1347_v63 }
 0xb42   :  { %2047 = vrcp.f32 %v1332_v44 }
 0xb47   :  { %v2589_v22 = vpop.eup %2045 }
 0xb48   :  { %v1091_v42 = vsel %vm179_vm11, %v2589_v22, 0.0  ;;  %v2593_v46 = vpop.eup %2047 }
 0xb49   :  { %1092 = vadd.xlane.f32.xlu0 %v1091_v42  ;;  %v1337_v18 = vmul.f32 %v2593_v46, %v1332_v44  ;;  %vm1342_vm5 = vweird.f32 %v2593_v46 }
 0xb4a   :  { %vm2609_vm10 = vmor %vm1341_vm8, %vm1342_vm5  ;;  %vm1356_vm8 = vweird.f32 %v2595_v49 }
 0xb4b   :  { %v1338_v51 = vsub.f32 1.0, %v1337_v18 }
 0xb4d   :  { %v1339_v37 = vmul.f32 %v2593_v46, %v1338_v51 }
 0xb4f   :  { %v1340_v43 = vadd.f32 %v2593_v46, %v1339_v37  ;;  %v1362_v37 = vand.u32 2147483648, %v2595_v49 }
 0xb51   :  { %v1344_v20 = vsel %vm2609_vm10, %v2593_v46, %v1340_v43 }
 0xbab   :  { %v1430_v50 = vpop.xlane.xlu1 %1429 }
 0xbac   :  { %2049 = vrcp.f32 %v1430_v50  ;;  %v1445_v6 = vand.u32 2147483648, %v1430_v50  ;;  %v1443_v41 = vand.u32 2147483647, %v1430_v50  ;;  %vm1439_vm6 = vweird.f32 %v1430_v50 }
 0xbad   :  { %2051 = vrcp.f32 %v2595_v49 }
 0xbae   :  { %v1446_v45 = vor.u32 1.1754944e-38, %v1445_v6  ;;  %vm1444_vm9 = vcmp.eq.f32.partialorder %v1443_v41, 8.507059e+37 }
 0xbb2   :  { %v2050_v8 = vpop.eup %2049 }
 0xbb3   :  { %v2599_v52 = vpop.eup %2051  ;;  %v1435_v5 = vmul.f32 %v2050_v8, %v1430_v50  ;;  %v1090_v56 = vpop.xlane.xlu1 %1089  ;;  %vm1440_vm4 = vweird.f32 %v2050_v8 }
 0xbb4   :  { %2053 = vrcp.f32 %v1090_v56  ;;  %v2601_v23 = vpop.xlane.xlu0 %1432  ;;  %v1352_v24 = vmul.f32 %v2599_v52, %v2595_v49  ;;  %vm1441_vm7 = vmor %vm1439_vm6, %vm1440_vm4  ;;  %v1105_v12 = vand.u32 2147483648, %v1090_v56  ;;  %v1103_v32 = vand.u32 2147483647, %v1090_v56 }
 0xbb5   :  { %v1436_v58 = vsub.f32 1.0, %v1435_v5  ;;  %2055 = vrcp.f32 %v2601_v23  ;;  %v1460_v34 = vand.u32 2147483648, %v2601_v23  ;;  %v1458_v40 = vand.u32 2147483647, %v2601_v23 }
 0xbb6   :  { %v1353_v9 = vsub.f32 1.0, %v1352_v24  ;;  %vm1357_vm1 = vweird.f32 %v2599_v52  ;;  %vm1099_vm2 = vweird.f32 %v1090_v56  ;;  %v1106_v44 = vor.u32 1.1754944e-38, %v1105_v12 }
 0xbb7   :  { %v1437_v47 = vmul.f32 %v2050_v8, %v1436_v58  ;;  %vm1454_vm4 = vweird.f32 %v2601_v23  ;;  %vm1104_vm5 = vcmp.eq.f32.partialorder %v1103_v32, 8.507059e+37  ;;  %v1360_v24 = vand.u32 2147483647, %v2595_v49 }
 0xbb8   :  { %v1354_v33 = vmul.f32 %v2599_v52, %v1353_v9 }
 0xbb9   :  { %v1438_v0 = vadd.f32 %v2050_v8, %v1437_v47 }
 0xbba   :  { %v2054_v3 = vpop.eup %2053  ;;  %v1355_v18 = vadd.f32 %v2599_v52, %v1354_v33 }
 0xbbb   :  { %v2056_v10 = vpop.eup %2055  ;;  %v1442_v17 = vsel %vm1441_vm7, %v2050_v8, %v1438_v0  ;;  %v1095_v60 = vmul.f32 %v2054_v3, %v1090_v56  ;;  %vm1100_vm12 = vweird.f32 %v2054_v3  ;;  %v1461_v8 = vor.u32 1.1754944e-38, %v1460_v34 }
 0xbbc   :  { %v1447_v14 = vsel %vm1444_vm9, %v1446_v45, %v1442_v17  ;;  %v1450_v16 = vmul.f32 %v2056_v10, %v2601_v23  ;;  %v2614_v19 = vpop.xlane.xlu0 %1092  ;;  %vm1455_vm13 = vweird.f32 %v2056_v10  ;;  %vm1101_vm3 = vmor %vm1099_vm2, %vm1100_vm12  ;;  %vm1459_vm7 = vcmp.eq.f32.partialorder %v1458_v40, 8.507059e+37 }
 0xbbd   :  { %v1096_v26 = vsub.f32 1.0, %v1095_v60  ;;  %2057 = vrcp.f32 %v2614_v19  ;;  %v1448_v28 = vmul.f32 %v2577_v27, %v1447_v14  ;;  %v1349_v27 = vsel %vm1346_vm14, %v1348_v15, %v1344_v20  ;;  %vm1456_vm6 = vmor %vm1454_vm4, %vm1455_vm13 }
 0xbbe   :  { %v1451_v53 = vsub.f32 1.0, %v1450_v16  ;;  %vm2641_vm9 = vmor %vm1356_vm8, %vm1357_vm1  ;;  %v1120_v43 = vand.u32 2147483648, %v2614_v19  ;;  %vm1361_vm12 = vcmp.eq.f32.partialorder %v1360_v24, 8.507059e+37  ;;  %vm1114_vm13 = vweird.f32 %v2614_v19 }
 0xbbf   :  { %v1097_v31 = vmul.f32 %v2054_v3, %v1096_v26  ;;  %1957 = vmatmul.msk.f32.vlgmr.msrb.gmra.mxu2 %vm179_vm11, %v1448_v28 }
 0xbc0   :  { %v1452_v29 = vmul.f32 %v2056_v10, %v1451_v53  ;;  %1814 = vmatpush.msrb.mxu2 %v2404_v55  ;;  %v1121_v0 = vor.u32 1.1754944e-38, %v1120_v43  ;;  %v2688_v43 = vld [vmem:[%s2749_s8] ss:$0 sm:$0xff] }
 0xbc1   :  { %v1098_v42 = vadd.f32 %v2054_v3, %v1097_v31 }
 0xbc2   :  { %v1453_v46 = vadd.f32 %v2056_v10, %v1452_v29  ;;  %1815 = vmatpush.msrb.mxu2 %v2412_v61  ;;  %v1350_v61 = vmul.f32 %v2536_v11, %v1349_v27  ;;  %v1118_v11 = vand.u32 2147483647, %v2614_v19 }
 0xbc3   :  { %v2058_v50 = vpop.eup %2057  ;;  %v1102_v51 = vsel %vm1101_vm3, %v2054_v3, %v1098_v42 }
 0xbc4   :  { %v1107_v5 = vsel %vm1104_vm5, %v1106_v44, %v1102_v51  ;;  %v1457_v56 = vsel %vm1456_vm6, %v2056_v10, %v1453_v46  ;;  %v1110_v55 = vmul.f32 %v2058_v50, %v2614_v19  ;;  %1816 = vmatpush.msrb.mxu2 %v2421_v48  ;;  %v1359_v48 = vsel %vm2641_vm9, %v2599_v52, %v1355_v18 }
 0xbc5   :  { %v1462_v23 = vsel %vm1459_vm7, %v1461_v8, %v1457_v56  ;;  %v1108_v58 = vmul.f32 %v2581_v35, %v1107_v5  ;;  %vm1115_vm10 = vweird.f32 %v2058_v50  ;;  %vm1119_vm1 = vcmp.eq.f32.partialorder %v1118_v11, 8.507059e+37 }
 0xbc6   :  { %v1111_v6 = vsub.f32 1.0, %v1110_v55  ;;  %v1463_v47 = vmul.f32 %v2583_v36, %v1462_v23  ;;  %1817 = vmatpush.msrb.mxu2 %v2429_v21  ;;  %v1363_v36 = vor.u32 1.1754944e-38, %v1362_v37  ;;  %vm1116_vm14 = vmor %vm1114_vm13, %vm1115_vm10 }
 0xbc7   :  { %1959 = vmatmul.msk.f32.vlgmr.msrb.gmra.mxu0 %vm179_vm11, %v1108_v58  ;;  %1961 = vmatmul.msk.f32.vlgmr.msra.gmra.mxu2 %vm179_vm11, %v1350_v61 }
 0xbc8   :  { %v1112_v35 = vmul.f32 %v2058_v50, %v1111_v6  ;;  %1958 = vmatmul.msk.f32.vlgmr.msrb.gmra.mxu3 %vm179_vm11, %v1463_v47  ;;  %1818 = vmatpush.msrb.mxu2 %v2435_v54  ;;  %v1364_v21 = vsel %vm1361_vm12, %v1363_v36, %v1359_v48  ;;  %v2682_v47 = vld [vmem:[%s2748_s7] ss:$0 sm:$0xff] }
 0xbc9   :  { %v1365_v45 = vmul.f32 %v2542_v57, %v1364_v21 }
 0xbca   :  { %v1113_v49 = vadd.f32 %v2058_v50, %v1112_v35  ;;  %1819 = vmatpush.msrb.mxu2 %v2441_v59 }
 0xbcc   :  { %v1117_v52 = vsel %vm1116_vm14, %v2058_v50, %v1113_v49  ;;  %1820 = vmatpush.msrb.mxu2 %v2447_v2 }
 0xbcd   :  { %v1122_v3 = vsel %vm1119_vm1, %v1121_v0, %v1117_v52  ;;  %v2078_v52 = vld [vmem:[%s2745_s4] ss:$0 sm:$0xff] }
 0xbce   :  { %v1123_v9 = vmul.f32 %v2589_v22, %v1122_v3  ;;  %1821 = vmatpush.msrb.mxu2 %v2453_v13 }
 0xbd0   :  { %1960 = vmatmul.msk.f32.vlgmr.msra.gmra.mxu1 %vm179_vm11, %v1123_v9  ;;  %1962 = vmatmul.msk.f32.vlgmr.msra.gmra.mxu3 %vm179_vm11, %v1365_v45 }
 0xc42   :  { %v1484_v54 = vpop.f32.mrf.mxu2 }
 0xc44   :  { %v1530_v10 = vpop.f32.mrf.mxu0 }
 0xc45   :  { %v1531_v59 = vadd.f32 %v1530_v10, %v2568_v7 }
 0xc4a   :  { %v1576_v60 = vpop.f32.mrf.mxu2 }
 0xc4b   :  { %v1507_v17 = vpop.f32.mrf.mxu3  ;;  %v1577_v62 = vadd.f32 %v1576_v60, %v1484_v54 }
 0xc4d   :  { %v1602_v63 = vadd.f32 %v1577_v62, %v1531_v59  ;;  %v1553_v2 = vpop.f32.mrf.mxu1 }
 0xc4e   :  { %v1554_v57 = vadd.f32 %v1553_v2, %v2570_v1 }
 0xc4f   :  { %1963 = vmatmul.msk.f32.vlgmr.msra.gmra.mxu0 %vm93_vm0, %v1602_v63 }
 0xc53   :  { %v1599_v22 = vpop.f32.mrf.mxu3 }
 0xc54   :  { %v1600_v14 = vadd.f32 %v1599_v22, %v1507_v17 }
 0xc56   :  { %v1603_v13 = vadd.f32 %v1600_v14, %v1554_v57 }
 0xc58   :  { %1964 = vmatmul.msk.f32.gmra.mxu0 %vm93_vm0, %v1603_v13 }
 0xccc   :  { %v1627_v16 = vpop.f32.mrf.mxu0 }
 0xccd   :  { %v1628_v19 = vadd.f32 %v2490_v38, %v1627_v16 }
 0xccf   :  { %v1633_v20 = vadd.f32 %v1628_v19, %v2477_v30 }
 0xcd1   :  { %v1635_v25 = vsel %vm93_vm0, %v1633_v20, 0.0 }
 0xcd2   :  { %1636 = vadd.xlane.f32.xlu1 %v1635_v25 }
 0xcd5   :  { %v1630_v7 = vpop.f32.mrf.mxu0 }
 0xcd6   :  { %v1631_v26 = vadd.f32 %v2490_v38, %v1630_v7 }
 0xcd8   :  { %v1634_v33 = vadd.f32 %v1631_v26, %v2483_v39 }
 0xcda   :  { %v1638_v12 = vsel %vm93_vm0, %v1634_v33, 0.0 }
 0xcdb   :  { %1639 = vadd.xlane.f32.xlu2 %v1638_v12 }
 0xd45   :  { %v1637_v1 = vpop.xlane.xlu1 %1636 }
 0xd46   :  { %v1641_v53 = vmul.f32 %v1637_v1, %v2337_v4 }
 0xd48   :  { %v1643_v28 = vsub.f32 %v1633_v20, %v1641_v53 }
 0xd4a   :  { %v1645_v31 = vmul.f32 %v1643_v28, %v1643_v28 }
 0xd4c   :  { %v1647_v32 = vsel %vm93_vm0, %v1645_v31, 0.0 }
 0xd4d   :  { %1648 = vadd.xlane.f32.xlu0 %v1647_v32 }
 0xd4e   :  { %v1640_v30 = vpop.xlane.xlu2 %1639 }
 0xd4f   :  { %v1642_v34 = vmul.f32 %v1640_v30, %v2337_v4 }
 0xd51   :  { %v1644_v15 = vsub.f32 %v1634_v33, %v1642_v34 }
 0xd53   :  { %v1646_v29 = vmul.f32 %v1644_v15, %v1644_v15 }
 0xd55   :  { %v1650_v38 = vsel %vm93_vm0, %v1646_v29, 0.0 }
 0xd56   :  { %1651 = vadd.xlane.f32.xlu1 %v1650_v38 }
 0xdc0   :  { %v1649_v39 = vpop.xlane.xlu0 %1648 }
 0xdc1   :  { %v1653_v40 = vmul.f32 %v1649_v39, %v2337_v4 }
 0xdc3   :  { %v1655_v42 = vadd.f32 1e-05, %v1653_v40 }
 0xdc5   :  { %2059 = vrsqrt.f32 %v1655_v42  ;;  %vm1663_vm2 = vweird.f32 %v1655_v42 }
 0xdc9   :  { %v1652_v27 = vpop.xlane.xlu1 %1651 }
 0xdca   :  { %v1654_v44 = vmul.f32 %v1652_v27, %v2337_v4 }
 0xdcb   :  { %v2060_v46 = vpop.eup %2059 }
 0xdcc   :  { %v1656_v50 = vadd.f32 1e-05, %v1654_v44  ;;  %v1658_v18 = vmul.f32 %v2060_v46, %v1655_v42  ;;  %vm1664_vm11 = vweird.f32 %v2060_v46 }
 0xdcd   :  { %vm1665_vm3 = vmor %vm1663_vm2, %vm1664_vm11 }
 0xdce   :  { %2061 = vrsqrt.f32 %v1656_v50  ;;  %v1659_v51 = vmul.f32 %v2060_v46, %v1658_v18  ;;  %vm1673_vm5 = vweird.f32 %v1656_v50 }
 0xdd0   :  { %v1660_v8 = vmul.f32 0.5, %v1659_v51 }
 0xdd2   :  { %v1661_v5 = vsub.f32 1.5, %v1660_v8 }
 0xdd4   :  { %v2062_v56 = vpop.eup %2061  ;;  %v1662_v55 = vmul.f32 %v2060_v46, %v1661_v5 }
 0xdd5   :  { %v1668_v37 = vmul.f32 %v2062_v56, %v1656_v50  ;;  %vm1674_vm4 = vweird.f32 %v2062_v56 }
 0xdd6   :  { %v1666_v23 = vsel %vm1665_vm3, %v2060_v46, %v1662_v55  ;;  %vm1675_vm6 = vmor %vm1673_vm5, %vm1674_vm4 }
 0xdd7   :  { %v1669_v58 = vmul.f32 %v2062_v56, %v1668_v37  ;;  %v1677_v24 = vmul.f32 %v1666_v23, %v1643_v28 }
 0xdd9   :  { %v1670_v6 = vmul.f32 0.5, %v1669_v58  ;;  %v1679_v61 = vmul.f32 %v2682_v47, %v1677_v24 }
 0xddb   :  { %v1671_v41 = vsub.f32 1.5, %v1670_v6  ;;  %v2691_v48 = vadd.f32 %v2688_v43, %v1679_v61 }
 0xddd   :  { %v1672_v35 = vmul.f32 %v2062_v56, %v1671_v41  ;;  %1965 = vmatmul.msk.f32.vlgmr.msrb.gmra.mxu1 %vm93_vm0, %v2691_v48 }
 0xddf   :  { %v1676_v11 = vsel %vm1675_vm6, %v2062_v56, %v1672_v35 }
 0xde0   :  { %v1678_v36 = vmul.f32 %v1676_v11, %v1644_v15 }
 0xde2   :  { %v1680_v49 = vmul.f32 %v2682_v47, %v1678_v36 }
 0xde4   :  { %v2697_v21 = vadd.f32 %v2688_v43, %v1680_v49 }
 0xde6   :  { %1966 = vmatmul.msk.f32.gmra.mxu1 %vm93_vm0, %v2697_v21 }
 0xe5a   :  { %v1706_v0 = vpop.f32.mrf.mxu1 }
 0xe5b   :  { %v2704_v3 = vadd.f32 %v2078_v52, %v1706_v0 }
 0xe5d   :  { %v1714_v9 = vmul.f32 0.70710677, %v2704_v3 }
 0xe5f   :  { %v1716_v45 = vmul.f32 %v1714_v9, %v1714_v9 }
 0xe61   :  { %v1717_v54 = vmin.f32 %v1716_v45, 16.0 }
 0xe63   :  { %v1709_v10 = vpop.f32.mrf.mxu1  ;;  %v1718_v17 = vmul.f32 2.1237322e-06, %v1717_v54  ;;  %v1729_v60 = vmul.f32 3.8918573e-05, %v1717_v54 }
 0xe64   :  { %v2707_v59 = vadd.f32 %v2078_v52, %v1709_v10 }
 0xe65   :  { %v1719_v62 = vadd.f32 0.00028619796, %v1718_v17  ;;  %v1730_v63 = vadd.f32 0.001143296, %v1729_v60 }
 0xe66   :  { %v2710_v2 = vmul.f32 0.70710677, %v2707_v59 }
 0xe67   :  { %v1720_v22 = vmul.f32 %v1719_v62, %v1717_v54  ;;  %v1731_v57 = vmul.f32 %v1730_v63, %v1717_v54 }
 0xe68   :  { %v1756_v14 = vmul.f32 %v2710_v2, %v2710_v2 }
 0xe69   :  { %v1732_v13 = vadd.f32 0.014752088, %v1731_v57  ;;  %v1721_v16 = vadd.f32 0.0036580483, %v1720_v22 }
 0xe6a   :  { %v1757_v19 = vmin.f32 %v1756_v14, 16.0  ;;  %v1712_v14 = vmul.f32 0.5, %v2704_v3 }
 0xe6b   :  { %v1733_v20 = vmul.f32 %v1732_v13, %v1717_v54  ;;  %v1722_v33 = vmul.f32 %v1721_v16, %v1717_v54 }
 0xe6c   :  { %v1758_v25 = vmul.f32 2.1237322e-06, %v1757_v19  ;;  %v1769_v7 = vmul.f32 3.8918573e-05, %v1757_v19 }
 0xe6d   :  { %v1734_v26 = vadd.f32 0.112945676, %v1733_v20  ;;  %v1723_v30 = vadd.f32 0.05243302, %v1722_v33 }
 0xe6e   :  { %v1759_v12 = vadd.f32 0.00028619796, %v1758_v25  ;;  %v1770_v1 = vadd.f32 0.001143296, %v1769_v7 }
 0xe6f   :  { %v1735_v53 = vmul.f32 %v1734_v26, %v1717_v54  ;;  %v1724_v40 = vmul.f32 %v1723_v30, %v1717_v54 }
 0xe70   :  { %v1760_v28 = vmul.f32 %v1759_v12, %v1757_v19  ;;  %v1771_v31 = vmul.f32 %v1770_v1, %v1757_v19  ;;  %v1713_v12 = vmul.f32 0.5, %v2707_v59 }
 0xe71   :  { %v1736_v32 = vadd.f32 0.4994258, %v1735_v53  ;;  %v1725_v46 = vadd.f32 0.18741608, %v1724_v40 }
 0xe72   :  { %v1772_v34 = vadd.f32 0.014752088, %v1771_v31  ;;  %v1761_v29 = vadd.f32 0.0036580483, %v1760_v28  ;;  %v2079_v28 = vld [vmem:[%s2747_s6] ss:$0 sm:$0xff] }
 0xe73   :  { %v1737_v15 = vmul.f32 %v1736_v32, %v1717_v54  ;;  %v1726_v5 = vmul.f32 %v1725_v46, %v1717_v54  ;;  %s2108_s6 = smov [#allocation2]  }
 0xe74   :  { %v1773_v38 = vmul.f32 %v1772_v34, %v1757_v19  ;;  %v1762_v27 = vmul.f32 %v1761_v29, %v1757_v19  ;;  %s1885_s21 = sshll.u32 %s2108_s6, 4  ;;  %s1886_s21 = int_to_ptr.vmem [resolvable:$true] %s1885_s21 }
 0xe75   :  { %v1738_v39 = vadd.f32 1.0, %v1737_v15  ;;  %v1727_v24 = vadd.f32 1.1283791, %v1726_v5 }
 0xe76   :  { %v1774_v42 = vadd.f32 0.112945676, %v1773_v38  ;;  %v1763_v18 = vadd.f32 0.05243302, %v1762_v27 }
 0xe77   :  { %2063 = vrcp.f32 %v1738_v39  ;;  %v1750_v58 = vand.u32 2147483648, %v1738_v39  ;;  %v1748_v61 = vand.u32 2147483647, %v1738_v39  ;;  %vm1744_vm8 = vweird.f32 %v1738_v39 }
 0xe78   :  { %v1775_v44 = vmul.f32 %v1774_v42, %v1757_v19  ;;  %v1764_v37 = vmul.f32 %v1763_v18, %v1757_v19  ;;  %v1728_v49 = vmul.f32 %v1727_v24, %v1714_v9 }
 0xe79   :  { %v1751_v11 = vor.u32 1.1754944e-38, %v1750_v58  ;;  %vm1749_vm10 = vcmp.eq.f32.partialorder %v1748_v61, 8.507059e+37 }
 0xe7a   :  { %v1776_v50 = vadd.f32 0.4994258, %v1775_v44  ;;  %v1765_v41 = vadd.f32 0.18741608, %v1764_v37 }
 0xe7c   :  { %v1777_v51 = vmul.f32 %v1776_v50, %v1757_v19  ;;  %v1766_v45 = vmul.f32 %v1765_v41, %v1757_v19 }
 0xe7d   :  { %v2064_v8 = vpop.eup %2063 }
 0xe7e   :  { %v1740_v56 = vmul.f32 %v2064_v8, %v1738_v39  ;;  %v1778_v55 = vadd.f32 1.0, %v1777_v51  ;;  %vm1745_vm7 = vweird.f32 %v2064_v8  ;;  %v1767_v63 = vadd.f32 1.1283791, %v1766_v45 }
 0xe7f   :  { %vm1746_vm9 = vmor %vm1744_vm8, %vm1745_vm7 }
 0xe80   :  { %v1741_v23 = vsub.f32 1.0, %v1740_v56  ;;  %2065 = vrcp.f32 %v1778_v55  ;;  %v1790_v62 = vand.u32 2147483648, %v1778_v55  ;;  %v1788_v57 = vand.u32 2147483647, %v1778_v55 }
 0xe81   :  { %vm1784_vm13 = vweird.f32 %v1778_v55  ;;  %v1768_v25 = vmul.f32 %v1767_v63, %v2710_v2 }
 0xe82   :  { %v1742_v6 = vmul.f32 %v2064_v8, %v1741_v23  ;;  %v1791_v9 = vor.u32 1.1754944e-38, %v1790_v62  ;;  %vm1789_vm1 = vcmp.eq.f32.partialorder %v1788_v57, 8.507059e+37 }
 0xe84   :  { %v1743_v35 = vadd.f32 %v2064_v8, %v1742_v6 }
 0xe86   :  { %v2066_v36 = vpop.eup %2065  ;;  %v1747_v0 = vsel %vm1746_vm9, %v2064_v8, %v1743_v35 }
 0xe87   :  { %v1752_v52 = vsel %vm1749_vm10, %v1751_v11, %v1747_v0  ;;  %v1780_v54 = vmul.f32 %v2066_v36, %v1778_v55  ;;  %vm1785_vm12 = vweird.f32 %v2066_v36 }
 0xe88   :  { %v1753_v10 = vmul.f32 %v1752_v52, %v1728_v49  ;;  %vm1786_vm14 = vmor %vm1784_vm13, %vm1785_vm12 }
 0xe89   :  { %v1781_v17 = vsub.f32 1.0, %v1780_v54 }
 0xe8a   :  { %v1967_v60 = vclamps-f32 %v1753_v10, 1.0 }
 0xe8b   :  { %v1782_v22 = vmul.f32 %v2066_v36, %v1781_v17 }
 0xe8c   :  { %v1796_v13 = vadd.f32 1.0, %v1967_v60 }
 0xe8d   :  { %v1783_v16 = vadd.f32 %v2066_v36, %v1782_v22 }
 0xe8e   :  { %v1798_v20 = vmul.f32 %v1796_v13, %v1712_v14 }
 0xe8f   :  { %v1787_v19 = vsel %vm1786_vm14, %v2066_v36, %v1783_v16 }
 0xe90   :  { %v1792_v7 = vsel %vm1789_vm1, %v1791_v9, %v1787_v19  ;;  %1969 = vmatmul.msk.f32.vlgmr.msrb.gmra.mxu2 %vm911_vm15, %v1798_v20 }
 0xe91   :  { %v1793_v26 = vmul.f32 %v1792_v7, %v1768_v25 }
 0xe93   :  { %v1968_v33 = vclamps-f32 %v1793_v26, 1.0 }
 0xe95   :  { %v1797_v1 = vadd.f32 1.0, %v1968_v33 }
 0xe97   :  { %v1799_v53 = vmul.f32 %v1797_v1, %v1713_v12 }
 0xe99   :  { %1970 = vmatmul.msk.f32.gmra.mxu2 %vm911_vm15, %v1799_v53 }
 0xf13   :  { %v1823_v3 = vpop.f32.mrf.mxu2 }
 0xf14   :  { %v1824_v31 = vadd.f32 %v2079_v28, %v1823_v3 }
 0xf16   :  { %v1829_v2 = vadd.f32 %v1824_v31, %v2691_v48 }
 0xf18   :  { %v1831_v32 = vsel %vm93_vm0, %v1829_v2, 0.0 }
 0xf19   :  { %1832 = vadd.xlane.f32.xlu2 %v1831_v32 }
 0xf1c   :  { %v1826_v30 = vpop.f32.mrf.mxu2 }
 0xf1d   :  { %v1827_v34 = vadd.f32 %v2079_v28, %v1826_v30 }
 0xf1f   :  { %v1830_v15 = vadd.f32 %v1827_v34, %v2697_v21 }
 0xf21   :  { %v1834_v59 = vsel %vm93_vm0, %v1830_v15, 0.0 }
 0xf22   :  { %1835 = vadd.xlane.f32.xlu0 %v1834_v59 }
 0xf8c   :  { %v1833_v29 = vpop.xlane.xlu2 %1832 }
 0xf8d   :  { %v1837_v38 = vmul.f32 %v1833_v29, %v2337_v4 }
 0xf8f   :  { %v1839_v39 = vsub.f32 %v1829_v2, %v1837_v38 }
 0xf91   :  { %v1841_v40 = vmul.f32 %v1839_v39, %v1839_v39 }
 0xf93   :  { %v1843_v42 = vsel %vm93_vm0, %v1841_v40, 0.0 }
 0xf94   :  { %1844 = vadd.xlane.f32.xlu1 %v1843_v42 }
 0xf95   :  { %v1836_v27 = vpop.xlane.xlu0 %1835 }
 0xf96   :  { %v1838_v48 = vmul.f32 %v1836_v27, %v2337_v4 }
 0xf98   :  { %v1840_v44 = vsub.f32 %v1830_v15, %v1838_v48 }
 0xf9a   :  { %v1842_v46 = vmul.f32 %v1840_v44, %v1840_v44 }
 0xf9c   :  { %v1846_v50 = vsel %vm93_vm0, %v1842_v46, 0.0 }
 0xf9d   :  { %1847 = vadd.xlane.f32.xlu2 %v1846_v50 }
0x1007   :  { %v1845_v21 = vpop.xlane.xlu1 %1844 }
0x1008   :  { %v1849_v18 = vmul.f32 %v1845_v21, %v2337_v4 }
0x100a   :  { %v1851_v51 = vadd.f32 1e-05, %v1849_v18 }
0x100c   :  { %2067 = vrsqrt.f32 %v1851_v51  ;;  %vm1859_vm11 = vweird.f32 %v1851_v51 }
0x1010   :  { %v1848_v8 = vpop.xlane.xlu2 %1847 }
0x1011   :  { %v1850_v5 = vmul.f32 %v1848_v8, %v2337_v4 }
0x1012   :  { %v2068_v56 = vpop.eup %2067 }
0x1013   :  { %v1854_v55 = vmul.f32 %v2068_v56, %v1851_v51  ;;  %v1852_v37 = vadd.f32 1e-05, %v1850_v5  ;;  %vm1860_vm15 = vweird.f32 %v2068_v56 }
0x1014   :  { %vm1861_vm2 = vmor %vm1859_vm11, %vm1860_vm15 }
0x1015   :  { %v1855_v23 = vmul.f32 %v2068_v56, %v1854_v55  ;;  %2069 = vrsqrt.f32 %v1852_v37  ;;  %vm1869_vm4 = vweird.f32 %v1852_v37 }
0x1017   :  { %v1856_v58 = vmul.f32 0.5, %v1855_v23 }
0x1019   :  { %v1857_v24 = vsub.f32 1.5, %v1856_v58 }
0x101b   :  { %v2070_v6 = vpop.eup %2069  ;;  %v1858_v61 = vmul.f32 %v2068_v56, %v1857_v24 }
0x101c   :  { %v1864_v41 = vmul.f32 %v2070_v6, %v1852_v37  ;;  %vm1870_vm3 = vweird.f32 %v2070_v6 }
0x101d   :  { %v1862_v35 = vsel %vm1861_vm2, %v2068_v56, %v1858_v61  ;;  %vm1871_vm5 = vmor %vm1869_vm4, %vm1870_vm3 }
0x101e   :  { %v1873_v11 = vmul.f32 %v1862_v35, %v1839_v39  ;;  %v1865_v36 = vmul.f32 %v2070_v6, %v1864_v41 }
0x1020   :  { %v1875_v49 = vmul.f32 %v2682_v47, %v1873_v11  ;;  %v1866_v0 = vmul.f32 0.5, %v1865_v36 }
0x1022   :  { %v1867_v4 = vsub.f32 1.5, %v1866_v0  ;;  %v1877_v52 = vadd.f32 %v2688_v43, %v1875_v49 }
0x1024   :  { %v1868_v45 = vmul.f32 %v2070_v6, %v1867_v4  ;;  %1879 = vst.msk [vmem:[#allocation2] sm:$0xff] %vm93_vm0, %v1877_v52 }
0x1026   :  { %v1872_v54 = vsel %vm1871_vm5, %v2070_v6, %v1868_v45 }
0x1027   :  { %v1874_v10 = vmul.f32 %v1872_v54, %v1840_v44 }
0x1029   :  { %v1876_v17 = vmul.f32 %v2682_v47, %v1874_v10 }
0x102b   :  { %v1878_v60 = vadd.f32 %v2688_v43, %v1876_v17 }
0x102d   :  { %1880 = vst.msk [vmem:[#allocation2 + $0x8] sm:$0xff] %vm93_vm0, %v1878_v60 }
0x102e   :  { %1893 = dma.vmem_to_hbm [thread:$0]  %s1886_s21, 256, %s1888_s23, [#allocation3], %s2109_s24, %s2109_s24, %s2110_s25  }
0x102f   :  { %2104 = dma.done.wait [#allocation3], 256  }
0x1030   :  { %2105 = vsyncadd [#allocation3], 4294967040 }
0x1031   :  { %1898 = vsyncpa [#allocation3], 1 }

</bundles_post_ra>
